<compile_context>
chip_gen: v5e
topology: v5e:2x2
jax: 0.10.0
libtpu: 0.0.40
codegen_flags: <defaults>
</compile_context>

<pallas_src>
import numpy as np
import jax
import jax.numpy as jnp
from jax.experimental import pallas as pl
from jax.experimental.pallas import tpu as pltpu

_LANES = 512  # lane-dense last dim of the working slab (multiple of 128)


def _weight_table(num_k: int, sigma: float) -> np.ndarray:
    """float32 softmax(-i^2 / (2*sigma)) -- matches the PyTorch module buffer."""
    i = np.arange(num_k, dtype=np.float32)
    logits = (-(i * i) / np.float32(2.0 * sigma)).astype(np.float32)
    e = np.exp(logits - logits.max()).astype(np.float32)
    return (e / e.sum(dtype=np.float32)).astype(np.float32)


def _make_kernel(w_vals, neg_inv_two_sigma, neg_lse):
    """w_vals[i] = weight_table[i]; log(w_i) is computed analytically in-kernel."""

    def kernel(pred_ref, idx_ref, valid_ref, out_ref):
        p = pred_ref[...].astype(jnp.float32)
        logp = jnp.log(p)                              # only transcendental (EUP slot)
        ixf = idx_ref[...].astype(jnp.float32)         # one upcast, reused for LUT + log-weight
        v = valid_ref[...]

        # analytic log-weight: log softmax(-i^2/(2*sigma))_i = -i^2/(2*sigma) - logZ
        logw = ixf * ixf * neg_inv_two_sigma + neg_lse

        # weight lookup: compare/select over only the nonzero table entries
        w = jnp.zeros_like(p)
        for i, wv in enumerate(w_vals):
            if wv > 0.0:
                w = jnp.where(ixf == float(i), wv, w)

        # F.kl_div(pred.log(), w) = w*(log w - log pred), zeroed where w == 0
        kl = jnp.where(w > 0.0, w * (logw - logp), 0.0)
        # valid is a {0, nonzero} mask (1 byte); select instead of f32 cast+mul
        out_ref[...] = jnp.where(v != 0, kl, 0.0).astype(out_ref.dtype)

    return kernel


def discrete_kl_loss(pred_dist, idx, valid, *, num_k=16, sigma=0.5, tile_rows=1024):
    """Element-wise kl_div(pred_dist.log(), weight[idx]) * valid (reduction='none').

    idx / valid are expected as narrow integer dtypes (int8/uint8/bool); valid is treated
    as a {0, nonzero} mask. Output dtype == pred_dist dtype.
    """
    wt = _weight_table(num_k, sigma)
    w_vals = tuple(float(x) for x in wt)
    # analytic log-softmax constants (f64 at build time, f32 splats in-kernel)
    ii = np.arange(num_k, dtype=np.float64)
    lg = -(ii * ii) / (2.0 * float(sigma))
    lse = float(lg.max() + np.log(np.exp(lg - lg.max()).sum()))
    neg_inv_two_sigma = float(-1.0 / (2.0 * float(sigma)))
    neg_lse = float(-lse)

    shape = pred_dist.shape
    out_dtype = pred_dist.dtype

    # Materialize broadcasts only if the caller's shapes really differ (identity otherwise).
    # TODO(synk): for genuinely-broadcast idx/valid in the real model, add a grid axis over
    # the broadcast dim instead of materializing the broadcast here.
    if idx.shape != shape:
        idx = jnp.broadcast_to(idx, shape)
    if valid.shape != shape:
        valid = jnp.broadcast_to(valid, shape)

    pred = pred_dist.reshape(-1)   # free reshapes, no dtype-cast passes
    ixs = idx.reshape(-1)
    vld = valid.reshape(-1)

    total = int(pred.size)
    pad = (-total) % _LANES
    if pad:
        # narrow-dtype tail pad only (never an f32 up-cast copy); sliced off below
        pred = jnp.pad(pred, (0, pad), constant_values=1)
        ixs = jnp.pad(ixs, (0, pad))
        vld = jnp.pad(vld, (0, pad))
    nrows = (total + pad) // _LANES

    # Row tile: multiple of 32 (int8 operand tiling), big enough to amortize per-step
    # overhead, small enough to keep >=2 (ideally >=8) grid steps so the "parallel" axis
    # can shard across TensorCores. Ragged last block is handled by the cdiv grid.
    tr = max(32, (int(tile_rows) // 32) * 32)
    tr_cap = max(32, pl.cdiv(pl.cdiv(nrows, 8), 32) * 32)
    tr = min(tr, tr_cap, nrows)          # == nrows (full dim) only for tiny inputs
    grid = pl.cdiv(nrows, tr)

    # Generation-aware VMEM request: double-buffered tiles + slack (not all of v7x's 64 MiB).
    bytes_per_row = _LANES * (
        pred.dtype.itemsize + ixs.dtype.itemsize + vld.dtype.itemsize
        + jnp.dtype(out_dtype).itemsize
    )
    vmem_limit = int(max(16 << 20, 2 * tr * bytes_per_row + (4 << 20)))

    def blk():
        return pl.BlockSpec((tr, _LANES), lambda r: (r, 0))

    out2 = pl.pallas_call(
        _make_kernel(w_vals, neg_inv_two_sigma, neg_lse),
        out_shape=jax.ShapeDtypeStruct((nrows, _LANES), out_dtype),
        grid=(grid,),
        in_specs=[blk(), blk(), blk()],
        out_specs=blk(),
        compiler_params=pltpu.CompilerParams(
            dimension_semantics=("parallel",),
            vmem_limit_bytes=vmem_limit,
        ),
    )(
        pred.reshape(nrows, _LANES),
        ixs.reshape(nrows, _LANES),
        vld.reshape(nrows, _LANES),
    )

    out = out2.reshape(-1)
    if pad:
        out = out[:total]
    return out.reshape(shape)


def _reference(pred_dist, idx, valid, *, num_k=16, sigma=0.5):
    """Pure-JAX mirror of the PyTorch module (for checking)."""
    wt = jnp.asarray(_weight_table(num_k, sigma))
    w = wt[idx]
    logw = jnp.log(jnp.where(w > 0, w, 1.0))
    kl = jnp.where(w > 0, w * (logw - jnp.log(pred_dist)), 0.0)
    return kl * valid.astype(kl.dtype)


if __name__ == "__main__":
    # 16*16*101 = 25856 elements: exercises the tail pad, the ragged last row-block,
    # and a multi-step "parallel" grid.
    num_k, A, B = 16, 16, 101
    key = jax.random.PRNGKey(0)
    k1, k2, k3 = jax.random.split(key, 3)

    logits = jax.random.normal(k1, (num_k, A, B), dtype=jnp.float32)
    pred_dist = jax.nn.softmax(logits, axis=0)  # strictly positive distribution, native f32
    idx = jax.random.randint(k2, (num_k, A, B), 0, num_k, dtype=jnp.int32).astype(jnp.int8)
    valid = (jax.random.uniform(k3, (num_k, A, B)) > 0.3).astype(jnp.int8)

    out = discrete_kl_loss(pred_dist, idx, valid, num_k=num_k, sigma=0.5)
    jax.block_until_ready(out)

    ref = _reference(pred_dist, idx, valid, num_k=num_k, sigma=0.5)
    assert out.shape == ref.shape and out.dtype == pred_dist.dtype
    max_err = float(jnp.max(jnp.abs(out - ref)))
    assert jnp.allclose(out, ref, rtol=1e-4, atol=1e-5), max_err

    print("KERNEL_OK")
</pallas_src>

<mosaic_0001>
module attributes {stable_mosaic.version = 11 : i64} {
  func.func @kernel(%arg0: i32, %arg1: memref<32x512xf32, #tpu.memory_space<vmem>>, %arg2: memref<32x512xi8, #tpu.memory_space<vmem>>, %arg3: memref<32x512xi8, #tpu.memory_space<vmem>>, %arg4: memref<32x512xf32, #tpu.memory_space<vmem>>) attributes {dimension_semantics = [#tpu.dimension_semantics<parallel>], iteration_bounds = array<i64: 2>, scalar_prefetch = 0 : i64, scratch_operands = 0 : i64, tpu.core_type = #tpu.core_type<tc>, window_params = [{transform_indices = @transform_0, window_bounds = array<i64: 32, 512>}, {transform_indices = @transform_1, window_bounds = array<i64: 32, 512>}, {transform_indices = @transform_2, window_bounds = array<i64: 32, 512>}, {transform_indices = @transform_3, window_bounds = array<i64: 32, 512>}]} {
    %c0 = arith.constant 0 : index
    %c0_0 = arith.constant 0 : index
    %0 = vector.load %arg1[%c0, %c0_0] : memref<32x512xf32, #tpu.memory_space<vmem>>, vector<32x512xf32>
    %1 = math.log %0 : vector<32x512xf32>
    %c0_1 = arith.constant 0 : index
    %c0_2 = arith.constant 0 : index
    %2 = vector.load %arg2[%c0_1, %c0_2] : memref<32x512xi8, #tpu.memory_space<vmem>>, vector<32x512xi8>
    %3 = arith.sitofp %2 : vector<32x512xi8> to vector<32x512xf32>
    %c0_3 = arith.constant 0 : index
    %c0_4 = arith.constant 0 : index
    %4 = vector.load %arg3[%c0_3, %c0_4] : memref<32x512xi8, #tpu.memory_space<vmem>>, vector<32x512xi8>
    %5 = arith.mulf %3, %3 : vector<32x512xf32>
    %cst = arith.constant -1.000000e+00 : f32
    %6 = vector.broadcast %cst : f32 to vector<32x512xf32>
    %7 = arith.mulf %5, %6 : vector<32x512xf32>
    %cst_5 = arith.constant -0.326651752 : f32
    %8 = vector.broadcast %cst_5 : f32 to vector<32x512xf32>
    %9 = arith.addf %7, %8 : vector<32x512xf32>
    %cst_6 = arith.constant 0.000000e+00 : f32
    %10 = vector.broadcast %cst_6 : f32 to vector<32x512xf32>
    %cst_7 = arith.constant 0.000000e+00 : f32
    %11 = vector.broadcast %cst_7 : f32 to vector<32x512xf32>
    %12 = arith.cmpf oeq, %3, %11 : vector<32x512xf32>
    %cst_8 = arith.constant 0.721334934 : f32
    %13 = vector.broadcast %cst_8 : f32 to vector<32x512xf32>
    %14 = arith.select %12, %13, %10 : vector<32x512xi1>, vector<32x512xf32>
    %cst_9 = arith.constant 1.000000e+00 : f32
    %15 = vector.broadcast %cst_9 : f32 to vector<32x512xf32>
    %16 = arith.cmpf oeq, %3, %15 : vector<32x512xf32>
    %cst_10 = arith.constant 0.265364289 : f32
    %17 = vector.broadcast %cst_10 : f32 to vector<32x512xf32>
    %18 = arith.select %16, %17, %14 : vector<32x512xi1>, vector<32x512xf32>
    %cst_11 = arith.constant 2.000000e+00 : f32
    %19 = vector.broadcast %cst_11 : f32 to vector<32x512xf32>
    %20 = arith.cmpf oeq, %3, %19 : vector<32x512xf32>
    %cst_12 = arith.constant 0.0132117104 : f32
    %21 = vector.broadcast %cst_12 : f32 to vector<32x512xf32>
    %22 = arith.select %20, %21, %18 : vector<32x512xi1>, vector<32x512xf32>
    %cst_13 = arith.constant 3.000000e+00 : f32
    %23 = vector.broadcast %cst_13 : f32 to vector<32x512xf32>
    %24 = arith.cmpf oeq, %3, %23 : vector<32x512xf32>
    %cst_14 = arith.constant 8.901980e-05 : f32
    %25 = vector.broadcast %cst_14 : f32 to vector<32x512xf32>
    %26 = arith.select %24, %25, %22 : vector<32x512xi1>, vector<32x512xf32>
    %cst_15 = arith.constant 4.000000e+00 : f32
    %27 = vector.broadcast %cst_15 : f32 to vector<32x512xf32>
    %28 = arith.cmpf oeq, %3, %27 : vector<32x512xf32>
    %cst_16 = arith.constant 8.11755498E-8 : f32
    %29 = vector.broadcast %cst_16 : f32 to vector<32x512xf32>
    %30 = arith.select %28, %29, %26 : vector<32x512xi1>, vector<32x512xf32>
    %cst_17 = arith.constant 5.000000e+00 : f32
    %31 = vector.broadcast %cst_17 : f32 to vector<32x512xf32>
    %32 = arith.cmpf oeq, %3, %31 : vector<32x512xf32>
    %cst_18 = arith.constant 1.00178589E-11 : f32
    %33 = vector.broadcast %cst_18 : f32 to vector<32x512xf32>
    %34 = arith.select %32, %33, %30 : vector<32x512xi1>, vector<32x512xf32>
    %cst_19 = arith.constant 6.000000e+00 : f32
    %35 = vector.broadcast %cst_19 : f32 to vector<32x512xf32>
    %36 = arith.cmpf oeq, %3, %35 : vector<32x512xf32>
    %cst_20 = arith.constant 1.67315278E-16 : f32
    %37 = vector.broadcast %cst_20 : f32 to vector<32x512xf32>
    %38 = arith.select %36, %37, %34 : vector<32x512xi1>, vector<32x512xf32>
    %cst_21 = arith.constant 7.000000e+00 : f32
    %39 = vector.broadcast %cst_21 : f32 to vector<32x512xf32>
    %40 = arith.cmpf oeq, %3, %39 : vector<32x512xf32>
    %cst_22 = arith.constant 3.78187668E-22 : f32
    %41 = vector.broadcast %cst_22 : f32 to vector<32x512xf32>
    %42 = arith.select %40, %41, %38 : vector<32x512xi1>, vector<32x512xf32>
    %cst_23 = arith.constant 8.000000e+00 : f32
    %43 = vector.broadcast %cst_23 : f32 to vector<32x512xf32>
    %44 = arith.cmpf oeq, %3, %43 : vector<32x512xf32>
    %cst_24 = arith.constant 1.15688481E-28 : f32
    %45 = vector.broadcast %cst_24 : f32 to vector<32x512xf32>
    %46 = arith.select %44, %45, %42 : vector<32x512xi1>, vector<32x512xf32>
    %cst_25 = arith.constant 9.000000e+00 : f32
    %47 = vector.broadcast %cst_25 : f32 to vector<32x512xf32>
    %48 = arith.cmpf oeq, %3, %47 : vector<32x512xf32>
    %cst_26 = arith.constant 4.78943098E-36 : f32
    %49 = vector.broadcast %cst_26 : f32 to vector<32x512xf32>
    %50 = arith.select %48, %49, %46 : vector<32x512xi1>, vector<32x512xf32>
    %cst_27 = arith.constant 1.000000e+01 : f32
    %51 = vector.broadcast %cst_27 : f32 to vector<32x512xf32>
    %52 = arith.cmpf oeq, %3, %51 : vector<32x512xf32>
    %cst_28 = arith.constant 2.662470e-44 : f32
    %53 = vector.broadcast %cst_28 : f32 to vector<32x512xf32>
    %54 = arith.select %52, %53, %50 : vector<32x512xi1>, vector<32x512xf32>
    %cst_29 = arith.constant 0.000000e+00 : f32
    %55 = vector.broadcast %cst_29 : f32 to vector<32x512xf32>
    %56 = arith.cmpf ogt, %54, %55 : vector<32x512xf32>
    %57 = arith.subf %9, %1 : vector<32x512xf32>
    %58 = arith.mulf %54, %57 : vector<32x512xf32>
    %cst_30 = arith.constant 0.000000e+00 : f32
    %59 = vector.broadcast %cst_30 : f32 to vector<32x512xf32>
    %60 = arith.select %56, %58, %59 : vector<32x512xi1>, vector<32x512xf32>
    %c0_i8 = arith.constant 0 : i8
    %61 = vector.broadcast %c0_i8 : i8 to vector<32x512xi8>
    %62 = arith.cmpi ne, %4, %61 : vector<32x512xi8>
    %cst_31 = arith.constant 0.000000e+00 : f32
    %63 = vector.broadcast %cst_31 : f32 to vector<32x512xf32>
    %64 = arith.select %62, %60, %63 : vector<32x512xi1>, vector<32x512xf32>
    %c0_32 = arith.constant 0 : index
    %c0_33 = arith.constant 0 : index
    %65 = vector.load %arg4[%c0_32, %c0_33] : memref<32x512xf32, #tpu.memory_space<vmem>>, vector<32x512xf32>
    tpu.vector_store %arg4[%c0_32, %c0_33], %64 {strides = array<i32>} : memref<32x512xf32, #tpu.memory_space<vmem>>, vector<32x512xf32>,
    return
  }
  func.func @transform_0(%arg0: i32) -> (i32, i32) {
    %c0_i32 = arith.constant 0 : i32
    %c0_i32_0 = arith.constant 0 : i32
    return %arg0, %c0_i32 : i32, i32
  }
  func.func @transform_1(%arg0: i32) -> (i32, i32) {
    %c0_i32 = arith.constant 0 : i32
    %c0_i32_0 = arith.constant 0 : i32
    return %arg0, %c0_i32 : i32, i32
  }
  func.func @transform_2(%arg0: i32) -> (i32, i32) {
    %c0_i32 = arith.constant 0 : i32
    %c0_i32_0 = arith.constant 0 : i32
    return %arg0, %c0_i32 : i32, i32
  }
  func.func @transform_3(%arg0: i32) -> (i32, i32) {
    %c0_i32 = arith.constant 0 : i32
    %c0_i32_0 = arith.constant 0 : i32
    return %arg0, %c0_i32 : i32, i32
  }
}

</mosaic_0001>

<bundles_post_ra>
// kernel: tpu_custom_call.1
= control target key start
LH: loop header
LB: loop body
LE: loop exit
PB: predicated region body
PF: predicated region fallthrough
CT: control target
= control target key end

     0   :  { %8 = vsyncpa [#allocation3], 0  ;;  %s2124_s0 = inlined_call_operand.hbm [shape: f32[51,512], index: 0, kind: input, shape index: {}]   ;;  %s2125_s1 = inlined_call_operand.hbm [shape: s8[51,512], index: 1, kind: input, shape index: {}]   ;;  %s2126_s2 = inlined_call_operand.hbm [shape: s8[51,512], index: 2, kind: input, shape index: {}]   ;;  %s2127_s3 = inlined_call_operand.hbm [shape: f32[51,512], index: 3, kind: output, shape index: {}]  }
   0x1   :  { %10 = vsyncpa [#allocation3 + $0x1], 0 }
   0x2   :  { %11 = vsyncpa [#allocation6], 0 }
   0x3   :  { %13 = vsyncpa [#allocation6 + $0x1], 0 }
   0x4   :  { %14 = vsyncpa [#allocation4], 0 }
   0x5   :  { %16 = vsyncpa [#allocation4 + $0x1], 0  ;;  %s1465_s12 = smov 0   ;;  %s1467_s13 = smov 0  }
   0x6   :  { %s1469_s14 = smov 0   ;;  %s1471_s15 = smov 0  }
   0x7 LB: > { %s1486_s16 = sadd.s32 4294967295, %s1429_s15   ;;  %s1090_s17 = sadd.s32 4294967294, %s1429_s15   ;;  %s1429_s15 = sphi %s1471_s15, %s2172_s15   ;;  %s1425_s14 = sphi %s1469_s14, %s2171_s14   ;;  %s1421_s13 = sphi %s1467_s13, %s2170_s13   ;;  %s1417_s12 = sphi %s1465_s12, %s2169_s12  }
   0x8   : > { %s1490_s18 = sadd.s32 1, %s1429_s15   ;;  %s29_s19 = sadd.s32 1, %s1425_s14 }
   0x9   : > { %s26_s20 = ssub.s32 %s1429_s15, %s1490_s18  ;;  %p36_p0 = scmp.ne.s32.totalorder %s1425_s14, %s1421_s13 }
   0xa   : > { %p27_p1 = scmp.eq.s32.totalorder %s26_s20, 0  ;;  %p37_p2 = scmp.eq.s32.totalorder %s1429_s15, 0 }
   0xb   : > { %p42_p3 = scmp.ne.s32.totalorder %s1421_s13, %s1417_s12  ;;  %p43_p4 = scmp.eq.s32.totalorder %s1486_s16, 0 }
   0xc   : > { %s1502_s21 = scalar_select %p27_p1, %s1425_s14, %s29_s19  }
   0xd   : > { %p1504_p5 = por %p37_p2, %p36_p0  ;;  %p1508_p6 = por %p43_p4, %p42_p3 }
   0xe   : > { %p118_p7 = scmp.eq.s32.totalorder %s1486_s16, 1  ;;  %p124_p8 = scmp.eq.s32.totalorder %s1090_s17, 1 }
   0xf   : > { %p2128_p11 = scmp.ge.s32.totalorder %s1429_s15, 2 }
  0x10   : > { %p1513_p9 = por %p118_p7, %p36_p0  ;;  %p1517_p10 = por %p124_p8, %p42_p3 }
  0x11   : > { %140 = sbr.rel (%p2128_p11) target bundleno = 130 (0x82), region = 16 }
  0x12   : > { %s2132_s25 = scalar_select %p1517_p10, 1, 0 }
  0x16   : > { %143 = sbr.rel (!%p1504_p5) target bundleno = 58 (0x3a), region = 20  ;;  %s144_s26 = sand.u32 (%p1504_p5), 1, %s1425_s14  }
  0x17   : > { %s1094_s27 = sshll.u32 (%p1504_p5), %s1429_s15, 2  ;;  %s1093_s28 = sshll.u32 (%p1504_p5), %s144_s26, 7 }
  0x18   : > { %s150_s29 = ssub.s32 (%p1504_p5), 7, %s1094_s27  ;;  %s1531_s6 = scalar_lea.sflag (%p1504_p5), [#allocation3], %s144_s26 }
  0x19   : > { %p151_p12 = scmp.lt.s32.totalorder (%p1504_p5), %s150_s29, 4  ;;  %s148_s7 = scalar_lea.vmem (%p1504_p5), [#allocation2], %s1093_s28 }
  0x1b   : > { %s2174_s29 = smov (!%p151_p12, %s150_s29), 4 }
  0x1c   : > { %s1136_s30 = sshll.u32 %s2174_s29, 5 }
  0x1d   : > { %s155_s4 = ssub.s32 128, %s1136_s30 }
  0x1e   : > { %s156_s5 = sshll.u32 %s155_s4, 4 }
  0x1f   : > { %157 = vsyncadd %s1531_s6, %s156_s5  ;;  %p1534_p13 = scmp.ne.s32.totalorder %s1136_s30, 0  ;;  %s1138_s9 = sshll.u32 %s1429_s15, 7 }
  0x20   : > { %s161_s17 = scalar_lea.hbm %s2124_s0, %s1138_s9  ;;  %s1542_s19 = sshll.u32 %s148_s7, 4  ;;  %s166_s19 = int_to_ptr.vmem [resolvable:$true] %s1542_s19 }
  0x21   : > { %s163_s20 = sshll.u32 %s161_s17, 4  ;;  %s1101_s26 = sshll.u32 %s2174_s29, 9  ;;  %s1545_s20 = int_to_ptr.hbm [resolvable:$true] %s163_s20 }
  0x22   : > { %s1231_s27 = sshra.s32 %s1545_s20, 4  ;;  %s1233_s28 = sshrl.u32 %s1101_s26, 4  ;;  %s1232_s27 = int_to_ptr.hbm [resolvable:$true] %s1231_s27 }
  0x23   : > { %s1238_s30 = scalar_lea.hbm %s1232_s27, %s1233_s28  ;;  %s1242_s7 = scalar_lea.hbm %s2124_s0, 224 }
  0x24   : > { %p1239_p0 = scmp.ne.s32.totalorder %s1232_s27, %s1238_s30  ;;  %p1243_p3 = scmp.lt.s32.totalorder %s1232_s27, %s2124_s0 }
  0x25   : > { %p1244_p4 = scmp.lt.s32.totalorder %s1242_s7, %s1238_s30 }
  0x26   : > { %p1240_p1 = pnand %p1239_p0, %p1534_p13 }
  0x27   : > { %p1245_p7 = por %p1244_p4, %p1243_p3 }
  0x28   : > { %p1241_p2 = pneg %p1240_p1 }
  0x2a   : > { %p1246_p8 = pnand %p1245_p7, %p1241_p2 }
  0x2c   : > { %1249 = shalt.err (!%p1246_p8)
}
  0x2d   : > { %s1250_s11 = sshra.s32 %s166_s19, 4  ;;  %s1431_s4 = smov [#allocation2]   ;;  %s1251_s11 = int_to_ptr.vmem [resolvable:$true] %s1250_s11 }
  0x2e   : > { %s1257_s17 = scalar_lea.vmem %s1251_s11, %s1233_s28  ;;  %s1261_s5 = scalar_lea.vmem %s1431_s4, 256 }
  0x2f   : > { %p1258_p12 = scmp.ne.s32.totalorder %s1251_s11, %s1257_s17  ;;  %p1263_p11 = scmp.lt.s32.totalorder %s1261_s5, %s1257_s17 }
  0x31   : > { %p1259_p0 = pnand %p1258_p12, %p1534_p13 }
  0x33   : > { %p1260_p1 = pneg %p1259_p0 }
  0x35   : > { %p1265_p10 = pnand %p1263_p11, %p1260_p1 }
  0x37   : > { %1268 = shalt.err (!%p1265_p10)
}
  0x38   : > { %s1432_s27 = smov 512   ;;  %s1433_s30 = smov 32  }
  0x39   : > { %171 = dma.hbm_to_vmem [thread:$0]  (%p1534_p13), %s1545_s20, %s1101_s26, %s166_s19, %s1531_s6, %s1432_s27, %s1432_s27, %s1433_s30  }
  0x3a PF: > { %174 = sbr.rel (!%p1504_p5) target bundleno = 94 (0x5e), region = 24  ;;  %s175_s28 = sand.u32 (%p1504_p5), 1, %s1429_s15  }
  0x3b   : > { %s177_s7 = sand.u32 (%p1504_p5), 1, %s1425_s14   ;;  %s1103_s10 = sshll.u32 (%p1504_p5), %s1429_s15, 2 }
  0x3c   : > { %s1102_s9 = sshll.u32 (%p1504_p5), %s177_s7, 5  ;;  %s181_s11 = ssub.s32 (%p1504_p5), 7, %s1103_s10 }
  0x3d   : > { %p182_p10 = scmp.lt.s32.totalorder (%p1504_p5), %s181_s11, 4  ;;  %s1579_s6 = scalar_lea.sflag (%p1504_p5), [#allocation6], %s175_s28 }
  0x3e   : > { %s179_s19 = scalar_lea.vmem (%p1504_p5), [#allocation5], %s1102_s9 }
  0x3f   : > { %s2176_s11 = smov (!%p182_p10, %s181_s11), 4 }
  0x40   : > { %s1139_s8 = sshll.u32 %s2176_s11, 3 }
  0x41   : > { %s186_s17 = ssub.s32 32, %s1139_s8 }
  0x42   : > { %s187_s29 = sshll.u32 %s186_s17, 4 }
  0x43   : > { %188 = vsyncadd %s1579_s6, %s187_s29  ;;  %p1582_p11 = scmp.ne.s32.totalorder %s1139_s8, 0  ;;  %s1141_s26 = sshll.u32 %s1429_s15, 5 }
  0x44   : > { %s192_s27 = scalar_lea.hbm %s2125_s1, %s1141_s26  ;;  %s1590_s30 = sshll.u32 %s179_s19, 4  ;;  %s197_s30 = int_to_ptr.vmem [resolvable:$true] %s1590_s30 }
  0x45   : > { %s194_s28 = sshll.u32 %s192_s27, 4  ;;  %s1110_s7 = sshll.u32 %s2176_s11, 7  ;;  %s1593_s28 = int_to_ptr.hbm [resolvable:$true] %s194_s28 }
  0x46   : > { %s1270_s9 = sshra.s32 %s1593_s28, 4  ;;  %s1272_s10 = sshrl.u32 %s1110_s7, 4  ;;  %s1271_s9 = int_to_ptr.hbm [resolvable:$true] %s1270_s9 }
  0x47   : > { %s1277_s8 = scalar_lea.hbm %s1271_s9, %s1272_s10  ;;  %s1281_s19 = scalar_lea.hbm %s2125_s1, 56 }
  0x48   : > { %p1278_p13 = scmp.ne.s32.totalorder %s1271_s9, %s1277_s8  ;;  %p1282_p4 = scmp.lt.s32.totalorder %s1271_s9, %s2125_s1 }
  0x49   : > { %p1283_p7 = scmp.lt.s32.totalorder %s1281_s19, %s1277_s8 }
  0x4a   : > { %p1279_p2 = pnand %p1278_p13, %p1582_p11 }
  0x4b   : > { %p1284_p8 = por %p1283_p7, %p1282_p4 }
  0x4c   : > { %p1280_p3 = pneg %p1279_p2 }
  0x4e   : > { %p1285_p12 = pnand %p1284_p8, %p1280_p3 }
  0x50   : > { %1288 = shalt.err (!%p1285_p12)
}
  0x51   : > { %s1289_s5 = sshra.s32 %s197_s30, 4  ;;  %s1434_s17 = smov [#allocation5]   ;;  %s1290_s5 = int_to_ptr.vmem [resolvable:$true] %s1289_s5 }
  0x52   : > { %s1296_s27 = scalar_lea.vmem %s1290_s5, %s1272_s10  ;;  %s1300_s29 = scalar_lea.vmem %s1434_s17, 64 }
  0x53   : > { %p1297_p0 = scmp.ne.s32.totalorder %s1290_s5, %s1296_s27  ;;  %p1302_p13 = scmp.lt.s32.totalorder %s1300_s29, %s1296_s27 }
  0x55   : > { %p1298_p1 = pnand %p1297_p0, %p1582_p11 }
  0x57   : > { %p1299_p10 = pneg %p1298_p1 }
  0x59   : > { %p1304_p2 = pnand %p1302_p13, %p1299_p10 }
  0x5b   : > { %1307 = shalt.err (!%p1304_p2)
}
  0x5c   : > { %s1435_s9 = smov 128   ;;  %s1436_s8 = smov 8  }
  0x5d   : > { %202 = dma.hbm_to_vmem [thread:$0]  (%p1582_p11), %s1593_s28, %s1110_s7, %s197_s30, %s1579_s6, %s1435_s9, %s1435_s9, %s1436_s8  }
  0x5e PF: > { %205 = sbr.rel (!%p1504_p5) target bundleno = 130 (0x82), region = 28  ;;  %s206_s10 = sand.u32 (%p1504_p5), 1, %s1429_s15  }
  0x5f   : > { %s208_s19 = sand.u32 (%p1504_p5), 1, %s1425_s14   ;;  %s1112_s4 = sshll.u32 (%p1504_p5), %s1429_s15, 2 }
  0x60   : > { %s1111_s26 = sshll.u32 (%p1504_p5), %s208_s19, 5  ;;  %s212_s5 = ssub.s32 (%p1504_p5), 7, %s1112_s4 }
  0x61   : > { %p213_p3 = scmp.lt.s32.totalorder (%p1504_p5), %s212_s5, 4  ;;  %s1627_s6 = scalar_lea.sflag (%p1504_p5), [#allocation6], %s206_s10 }
  0x62   : > { %s210_s22 = scalar_lea.vmem (%p1504_p5), [#allocation7], %s1111_s26 }
  0x63   : > { %s2178_s5 = smov (!%p213_p3, %s212_s5), 4 }
  0x64   : > { %s1142_s20 = sshll.u32 %s2178_s5, 3 }
  0x65   : > { %s217_s27 = ssub.s32 32, %s1142_s20 }
  0x66   : > { %s218_s11 = sshll.u32 %s217_s27, 4 }
  0x67   : > { %219 = vsyncadd %s1627_s6, %s218_s11  ;;  %p1630_p5 = scmp.ne.s32.totalorder %s1142_s20, 0  ;;  %s1144_s28 = sshll.u32 %s1429_s15, 5 }
  0x68   : > { %s223_s29 = scalar_lea.hbm %s2126_s2, %s1144_s28  ;;  %s1638_s9 = sshll.u32 %s210_s22, 4  ;;  %s228_s9 = int_to_ptr.vmem [resolvable:$true] %s1638_s9 }
  0x69   : > { %s225_s8 = sshll.u32 %s223_s29, 4  ;;  %s1119_s10 = sshll.u32 %s2178_s5, 7  ;;  %s1641_s8 = int_to_ptr.hbm [resolvable:$true] %s225_s8 }
  0x6a   : > { %s1309_s19 = sshra.s32 %s1641_s8, 4  ;;  %s1311_s26 = sshrl.u32 %s1119_s10, 4  ;;  %s1310_s19 = int_to_ptr.hbm [resolvable:$true] %s1309_s19 }
  0x6b   : > { %s1316_s4 = scalar_lea.hbm %s1310_s19, %s1311_s26  ;;  %s1320_s11 = scalar_lea.hbm %s2126_s2, 56 }
  0x6c   : > { %p1317_p11 = scmp.ne.s32.totalorder %s1310_s19, %s1316_s4  ;;  %p1321_p8 = scmp.lt.s32.totalorder %s1310_s19, %s2126_s2 }
  0x6d   : > { %p1322_p12 = scmp.lt.s32.totalorder %s1320_s11, %s1316_s4 }
  0x6e   : > { %p1318_p4 = pnand %p1317_p11, %p1630_p5 }
  0x6f   : > { %p1323_p0 = por %p1322_p12, %p1321_p8 }
  0x70   : > { %p1319_p7 = pneg %p1318_p4 }
  0x72   : > { %p1324_p1 = pnand %p1323_p0, %p1319_p7 }
  0x74   : > { %1327 = shalt.err (!%p1324_p1)
}
  0x75   : > { %s1328_s7 = sshra.s32 %s228_s9, 4  ;;  %s1437_s29 = smov [#allocation7]   ;;  %s1329_s7 = int_to_ptr.vmem [resolvable:$true] %s1328_s7 }
  0x76   : > { %s1335_s17 = scalar_lea.vmem %s1329_s7, %s1311_s26  ;;  %s1339_s20 = scalar_lea.vmem %s1437_s29, 64 }
  0x77   : > { %p1336_p10 = scmp.ne.s32.totalorder %s1329_s7, %s1335_s17  ;;  %p1341_p3 = scmp.lt.s32.totalorder %s1339_s20, %s1335_s17 }
  0x79   : > { %p1337_p13 = pnand %p1336_p10, %p1630_p5 }
  0x7b   : > { %p1338_p2 = pneg %p1337_p13 }
  0x7d   : > { %p1343_p11 = pnand %p1341_p3, %p1338_p2 }
  0x7f   : > { %1346 = shalt.err (!%p1343_p11)
}
  0x80   : > { %s1438_s19 = smov 128   ;;  %s1439_s4 = smov 8  }
  0x81   : > { %233 = dma.hbm_to_vmem [thread:$0]  (%p1630_p5), %s1641_s8, %s1119_s10, %s228_s9, %s1627_s6, %s1438_s19, %s1438_s19, %s1439_s4  }
  0x82 PF: > { %p1120_p4 = scmp.ge.s32.totalorder %s1429_s15, 1  ;;  %p235_p7 = scmp.lt.s32.totalorder %s1429_s15, 3 }
  0x84   : > { %p236_p8 = pnand %p1120_p4, %p235_p7 }
  0x85   : > { %s1670_s26 = sand.u32 (!%p236_p8), 1, %s1421_s13  }
  0x86   : > { %239 = sbr.rel (%p236_p8) target bundleno = 329 (0x149), region = 32  ;;  %s1121_s27 = sshll.u32 (!%p236_p8), %s1670_s26, 7 }
  0x87   : > { %s242_s30 = scalar_lea.sflag (!%p236_p8), [#allocation3], %s1670_s26  ;;  %s1676_s5 = scalar_lea.vmem (!%p236_p8), [#allocation2], %s1121_s27 }
  0x8b   : > { %1404 = dma.done.wait (%p1508_p6), %s242_s30, 2048  }
  0x8c   : > { %1406 = vsyncadd (%p1508_p6), %s242_s30, 4294965248  ;;  %s251_s6 = sand.u32 1, %s1486_s16   ;;  %s1122_s9 = sshll.u32 %s1670_s26, 5 }
  0x8d   : > { %s252_s8 = scalar_lea.sflag [#allocation6], %s251_s6  ;;  %s1684_s10 = scalar_lea.vmem [#allocation5], %s1122_s9 }
  0x8e   : > { %1408 = dma.done.wait (%p1508_p6), %s252_s8, 1024  }
  0x8f   : > { %1410 = vsyncadd (%p1508_p6), %s252_s8, 4294966272  ;;  %v325_v0 = vld [vmem:[%s1676_s5] sm:$0xff]  ;;  %s1692_s11 = scalar_lea.vmem [#allocation7], %s1122_s9  ;;  %v326_v4 = vld [vmem:[%s1676_s5 + $0x8] sm:$0xff]  ;;  %v1440_v7 = vmov 0   ;;  %v1441_v19 = vmov 0.0  }
  0x90   : > { %v373_v1 = vld [vmem:[%s1684_s10] sm:$0xff]  ;;  %1199 = vlog2.f32 %v325_v0  ;;  %v327_v6 = vld [vmem:[%s1676_s5 + $0x10] sm:$0xff]  ;;  %s1749_s23 = scalar_lea.vmem [#allocation8], %s1121_s27  ;;  %s950_s22 = scalar_lea.sflag [#allocation4], %s1670_s26 }
  0x91   : > { %v409_v2 = vld [vmem:[%s1692_s11] sm:$0xff]  ;;  %v377_v3 = vunpack.c.0.s8 %v373_v1  ;;  %v378_v5 = vunpack.c.1.s8 %v373_v1  ;;  %1201 = vlog2.f32 %v326_v4  ;;  %v379_v9 = vunpack.c.2.s8 %v373_v1  ;;  %s1126_s28 = sshll.u32 (%p1513_p9), %s1486_s16, 2 }
  0x92   : > { %vm877_vm0 = vnez %v409_v2  ;;  %v380_v10 = vunpack.c.3.s8 %v373_v1  ;;  %1203 = vlog2.f32 %v327_v6  ;;  %s958_s7 = ssub.s32 (%p1513_p9), 7, %s1126_s28 }
  0x93   : > { %v1698_v8 = vsel %vm877_vm0, 16843009, %v1440_v7  ;;  %v393_v11 = vcvt.s32.f32 %v377_v3  ;;  %v1701_v13 = vcvt.s32.f32 %v378_v5  ;;  %v1704_v15 = vcvt.s32.f32 %v379_v9  ;;  %v328_v3 = vld [vmem:[%s1676_s5 + $0x18] sm:$0xff]  ;;  %p959_p6 = scmp.lt.s32.totalorder (%p1513_p9), %s958_s7, 4 }
  0x94   : > { %v885_v12 = vunpack.c.0.s8 %v1698_v8  ;;  %v886_v14 = vunpack.c.1.s8 %v1698_v8  ;;  %v887_v16 = vunpack.c.2.s8 %v1698_v8  ;;  %v1707_v17 = vcvt.s32.f32 %v380_v10 }
  0x95   : > { %v413_v18 = vmul.f32 %v393_v11, %v393_v11  ;;  %vm461_vm1 = vcmp.eq.f32.partialorder %v393_v11, 0.0  ;;  %vm493_vm2 = vcmp.eq.f32.partialorder %v393_v11, 1.0  ;;  %vm525_vm3 = vcmp.eq.f32.partialorder %v393_v11, 2.0 }
  0x96   : > { %v477_v20 = vsel %vm461_vm1, 0.72133493, %v1441_v19  ;;  %vm557_vm4 = vcmp.eq.f32.partialorder %v393_v11, 3.0  ;;  %vm589_vm5 = vcmp.eq.f32.partialorder %v393_v11, 4.0  ;;  %vm621_vm6 = vcmp.eq.f32.partialorder %v393_v11, 5.0  ;;  %v1200_v21 = vpop.eup %1199 }
  0x97   : > { %v429_v22 = vmul.f32 -1.0, %v413_v18  ;;  %v509_v23 = vsel %vm493_vm2, 0.2653643, %v477_v20  ;;  %vm653_vm7 = vcmp.eq.f32.partialorder %v393_v11, 6.0  ;;  %vm685_vm8 = vcmp.eq.f32.partialorder %v393_v11, 7.0  ;;  %v1202_v24 = vpop.eup %1201 }
  0x98   : > { %v342_v25 = vmul.f32 0.6931472, %v1200_v21  ;;  %v541_v26 = vsel %vm525_vm3, 0.01321171, %v509_v23  ;;  %vm717_vm9 = vcmp.eq.f32.partialorder %v393_v11, 8.0  ;;  %vm749_vm10 = vcmp.eq.f32.partialorder %v393_v11, 9.0  ;;  %v1204_v30 = vpop.eup %1203 }
  0x99   : > { %v445_v27 = vadd.f32 -0.32665175, %v429_v22  ;;  %v573_v28 = vsel %vm557_vm4, 8.90198e-05, %v541_v26  ;;  %vm781_vm11 = vcmp.eq.f32.partialorder %v393_v11, 10.0  ;;  %vm1710_vm12 = vcmp.ne.s32.totalorder %v885_v12, 0 }
  0x9a   : > { %v605_v31 = vsel %vm589_vm5, 8.117555e-08, %v573_v28  ;;  %v344_v32 = vmul.f32 0.6931472, %v1202_v24  ;;  %v414_v33 = vmul.f32 %v1701_v13, %v1701_v13  ;;  %vm462_vm13 = vcmp.eq.f32.partialorder %v1701_v13, 0.0  ;;  %v329_v23 = vld [vmem:[%s1676_s5 + $0x20] sm:$0xff] }
  0x9b   : > { %v637_v34 = vsel %vm621_vm6, 1.0017859e-11, %v605_v31  ;;  %v829_v35 = vsub.f32 %v445_v27, %v342_v25  ;;  %v478_v36 = vsel %vm462_vm13, 0.72133493, %v1441_v19  ;;  %vm494_vm14 = vcmp.eq.f32.partialorder %v1701_v13, 1.0  ;;  %v1788_v26 = vld [vmem:[%s1684_s10 + $0x8] sm:$0xff] }
  0x9c   : > { %v669_v37 = vsel %vm653_vm7, 1.6731528e-16, %v637_v34  ;;  %v430_v38 = vmul.f32 -1.0, %v414_v33  ;;  %v510_v39 = vsel %vm494_vm14, 0.2653643, %v478_v36  ;;  %vm526_vm15 = vcmp.eq.f32.partialorder %v1701_v13, 2.0 }
  0x9d   : > { %v701_v40 = vsel %vm685_vm8, 3.7818767e-22, %v669_v37  ;;  %v542_v41 = vsel %vm526_vm15, 0.01321171, %v510_v39  ;;  %vm558_vm0 = vcmp.eq.f32.partialorder %v1701_v13, 3.0  ;;  %vm590_vm1 = vcmp.eq.f32.partialorder %v1701_v13, 4.0 }
  0x9e   : > { %v733_v42 = vsel %vm717_vm9, 1.1568848e-28, %v701_v40  ;;  %v446_v43 = vadd.f32 -0.32665175, %v430_v38  ;;  %v574_v44 = vsel %vm558_vm0, 8.90198e-05, %v542_v41  ;;  %v415_v45 = vmul.f32 %v1704_v15, %v1704_v15 }
  0x9f   : > { %v765_v46 = vsel %vm749_vm10, 4.789431e-36, %v733_v42  ;;  %v606_v47 = vsel %vm590_vm1, 8.117555e-08, %v574_v44  ;;  %vm622_vm2 = vcmp.eq.f32.partialorder %v1701_v13, 5.0  ;;  %vm654_vm3 = vcmp.eq.f32.partialorder %v1701_v13, 6.0 }
  0xa0   : > { %v797_v48 = vsel %vm781_vm11, 2.7e-44, %v765_v46  ;;  %v638_v49 = vsel %vm622_vm2, 1.0017859e-11, %v606_v47  ;;  %vm686_vm4 = vcmp.eq.f32.partialorder %v1701_v13, 7.0  ;;  %vm718_vm5 = vcmp.eq.f32.partialorder %v1701_v13, 8.0  ;;  %v410_v33 = vld [vmem:[%s1692_s11 + $0x8] sm:$0xff] }
  0xa1   : > { %vm813_vm6 = vcmp.gt.f32.partialorder %v797_v48, 0.0  ;;  %v845_v50 = vmul.f32 %v829_v35, %v797_v48  ;;  %v670_v51 = vsel %vm654_vm3, 1.6731528e-16, %v638_v49  ;;  %vm750_vm7 = vcmp.eq.f32.partialorder %v1701_v13, 9.0  ;;  %v330_v34 = vld [vmem:[%s1676_s5 + $0x28] sm:$0xff] }
  0xa2   : > { %v702_v52 = vsel %vm686_vm4, 3.7818767e-22, %v670_v51  ;;  %vm782_vm8 = vcmp.eq.f32.partialorder %v1701_v13, 10.0  ;;  %v830_v53 = vsub.f32 %v446_v43, %v344_v32  ;;  %vm1739_vm9 = vcmp.ne.s32.totalorder %v886_v14, 0  ;;  %v331_v43 = vld [vmem:[%s1676_s5 + $0x30] sm:$0xff] }
  0xa3   : > { %v861_v55 = vsel %vm813_vm6, %v845_v50, 0.0  ;;  %v734_v56 = vsel %vm718_vm5, 1.1568848e-28, %v702_v52  ;;  %v346_v57 = vmul.f32 0.6931472, %v1204_v30  ;;  %v431_v58 = vmul.f32 -1.0, %v415_v45 }
  0xa4   : > { %v917_v59 = vsel %vm1710_vm12, %v861_v55, 0.0  ;;  %v766_v60 = vsel %vm750_vm7, 4.789431e-36, %v734_v56  ;;  %vm463_vm10 = vcmp.eq.f32.partialorder %v1704_v15, 0.0  ;;  %vm495_vm11 = vcmp.eq.f32.partialorder %v1704_v15, 1.0 }
  0xa5   : > { %933 = vst [vmem:[%s1749_s23] sm:$0xff] %v917_v59  ;;  %v798_v61 = vsel %vm782_vm8, 2.7e-44, %v766_v60  ;;  %v447_v62 = vadd.f32 -0.32665175, %v431_v58  ;;  %v479_v63 = vsel %vm463_vm10, 0.72133493, %v1441_v19  ;;  %vm527_vm13 = vcmp.eq.f32.partialorder %v1704_v15, 2.0 }
  0xa6   : > { %vm814_vm14 = vcmp.gt.f32.partialorder %v798_v61, 0.0  ;;  %v846_v0 = vmul.f32 %v830_v53, %v798_v61  ;;  %v511_v1 = vsel %vm495_vm11, 0.2653643, %v479_v63  ;;  %vm559_vm12 = vcmp.eq.f32.partialorder %v1704_v15, 3.0 }
  0xa7   : > { %v543_v2 = vsel %vm527_vm13, 0.01321171, %v511_v1  ;;  %vm591_vm15 = vcmp.eq.f32.partialorder %v1704_v15, 4.0  ;;  %vm623_vm0 = vcmp.eq.f32.partialorder %v1704_v15, 5.0  ;;  %vm655_vm1 = vcmp.eq.f32.partialorder %v1704_v15, 6.0 }
  0xa8   : > { %v862_v4 = vsel %vm814_vm14, %v846_v0, 0.0  ;;  %v575_v5 = vsel %vm559_vm12, 8.90198e-05, %v543_v2  ;;  %vm687_vm2 = vcmp.eq.f32.partialorder %v1704_v15, 7.0  ;;  %vm719_vm3 = vcmp.eq.f32.partialorder %v1704_v15, 8.0 }
  0xa9   : > { %v918_v6 = vsel %vm1739_vm9, %v862_v4, 0.0  ;;  %v607_v9 = vsel %vm591_vm15, 8.117555e-08, %v575_v5  ;;  %vm751_vm4 = vcmp.eq.f32.partialorder %v1704_v15, 9.0  ;;  %vm783_vm5 = vcmp.eq.f32.partialorder %v1704_v15, 10.0 }
  0xaa   : > { %934 = vst [vmem:[%s1749_s23 + $0x8] sm:$0xff] %v918_v6  ;;  %v639_v10 = vsel %vm623_vm0, 1.0017859e-11, %v607_v9  ;;  %v831_v11 = vsub.f32 %v447_v62, %v346_v57  ;;  %vm1768_vm6 = vcmp.ne.s32.totalorder %v887_v16, 0  ;;  %1205 = vlog2.f32 %v328_v3 }
  0xab   : > { %v671_v13 = vsel %vm655_vm1, 1.6731528e-16, %v639_v10  ;;  %v416_v14 = vmul.f32 %v1707_v17, %v1707_v17  ;;  %vm464_vm7 = vcmp.eq.f32.partialorder %v1707_v17, 0.0  ;;  %vm496_vm8 = vcmp.eq.f32.partialorder %v1707_v17, 1.0 }
  0xac   : > { %v703_v18 = vsel %vm687_vm2, 3.7818767e-22, %v671_v13  ;;  %v480_v20 = vsel %vm464_vm7, 0.72133493, %v1441_v19  ;;  %vm528_vm9 = vcmp.eq.f32.partialorder %v1707_v17, 2.0  ;;  %vm560_vm10 = vcmp.eq.f32.partialorder %v1707_v17, 3.0 }
  0xad   : > { %v735_v16 = vsel %vm719_vm3, 1.1568848e-28, %v703_v18  ;;  %v432_v21 = vmul.f32 -1.0, %v416_v14  ;;  %v512_v22 = vsel %vm496_vm8, 0.2653643, %v480_v20  ;;  %vm592_vm11 = vcmp.eq.f32.partialorder %v1707_v17, 4.0 }
  0xae   : > { %v767_v24 = vsel %vm751_vm4, 4.789431e-36, %v735_v16  ;;  %v544_v25 = vsel %vm528_vm9, 0.01321171, %v512_v22  ;;  %vm624_vm13 = vcmp.eq.f32.partialorder %v1707_v17, 5.0  ;;  %vm656_vm14 = vcmp.eq.f32.partialorder %v1707_v17, 6.0 }
  0xaf   : > { %v799_v27 = vsel %vm783_vm5, 2.7e-44, %v767_v24  ;;  %v448_v28 = vadd.f32 -0.32665175, %v432_v21  ;;  %v576_v29 = vsel %vm560_vm10, 8.90198e-05, %v544_v25  ;;  %vm688_vm12 = vcmp.eq.f32.partialorder %v1707_v17, 7.0 }
  0xb0   : > { %v1206_v30 = vpop.eup %1205  ;;  %vm815_vm15 = vcmp.gt.f32.partialorder %v799_v27, 0.0  ;;  %v847_v31 = vmul.f32 %v831_v11, %v799_v27  ;;  %v608_v32 = vsel %vm592_vm11, 8.117555e-08, %v576_v29  ;;  %vm720_vm0 = vcmp.eq.f32.partialorder %v1707_v17, 8.0 }
  0xb1   : > { %v348_v35 = vmul.f32 0.6931472, %v1206_v30  ;;  %v640_v36 = vsel %vm624_vm13, 1.0017859e-11, %v608_v32  ;;  %vm752_vm1 = vcmp.eq.f32.partialorder %v1707_v17, 9.0  ;;  %vm784_vm2 = vcmp.eq.f32.partialorder %v1707_v17, 10.0 }
  0xb2   : > { %v863_v15 = vsel %vm815_vm15, %v847_v31, 0.0  ;;  %v672_v37 = vsel %vm656_vm14, 1.6731528e-16, %v640_v36  ;;  %v888_v38 = vunpack.c.3.s8 %v1698_v8  ;;  %1207 = vlog2.f32 %v329_v23  ;;  %v333_v36 = vld [vmem:[%s1676_s5 + $0x40] sm:$0xff] }
  0xb3   : > { %v919_v39 = vsel %vm1768_vm6, %v863_v15, 0.0  ;;  %v704_v40 = vsel %vm688_vm12, 3.7818767e-22, %v672_v37  ;;  %v832_v41 = vsub.f32 %v448_v28, %v348_v35  ;;  %v381_v42 = vunpack.c.0.s8 %v1788_v26  ;;  %v332_v28 = vld [vmem:[%s1676_s5 + $0x38] sm:$0xff]  ;;  %v1847_v15 = vld [vmem:[%s1684_s10 + $0x10] sm:$0xff] }
  0xb4   : > { %935 = vst [vmem:[%s1749_s23 + $0x10] sm:$0xff] %v919_v39  ;;  %v736_v44 = vsel %vm720_vm0, 1.1568848e-28, %v704_v40  ;;  %vm1810_vm3 = vcmp.ne.s32.totalorder %v888_v38, 0  ;;  %vm878_vm4 = vnez %v410_v33  ;;  %1209 = vlog2.f32 %v330_v34 }
  0xb5   : > { %v768_v8 = vsel %vm752_vm1, 4.789431e-36, %v736_v44  ;;  %v397_v46 = vcvt.s32.f32 %v381_v42  ;;  %v1817_v47 = vsel %vm878_vm4, 16843009, %v1440_v7  ;;  %v382_v48 = vunpack.c.1.s8 %v1788_v26 }
  0xb6   : > { %v800_v49 = vsel %vm784_vm2, 2.7e-44, %v768_v8  ;;  %v889_v50 = vunpack.c.0.s8 %v1817_v47  ;;  %v890_v51 = vunpack.c.1.s8 %v1817_v47  ;;  %1211 = vlog2.f32 %v331_v43 }
  0xb7   : > { %vm816_vm5 = vcmp.gt.f32.partialorder %v800_v49, 0.0  ;;  %v848_v52 = vmul.f32 %v832_v41, %v800_v49  ;;  %v417_v53 = vmul.f32 %v397_v46, %v397_v46  ;;  %vm465_vm6 = vcmp.eq.f32.partialorder %v397_v46, 0.0 }
  0xb8   : > { %v1208_v54 = vpop.eup %1207  ;;  %v481_v55 = vsel %vm465_vm6, 0.72133493, %v1441_v19  ;;  %vm497_vm7 = vcmp.eq.f32.partialorder %v397_v46, 1.0  ;;  %vm529_vm8 = vcmp.eq.f32.partialorder %v397_v46, 2.0  ;;  %vm561_vm9 = vcmp.eq.f32.partialorder %v397_v46, 3.0 }
  0xb9   : > { %v864_v56 = vsel %vm816_vm5, %v848_v52, 0.0  ;;  %v350_v57 = vmul.f32 0.6931472, %v1208_v54  ;;  %v433_v17 = vmul.f32 -1.0, %v417_v53  ;;  %v513_v58 = vsel %vm497_vm7, 0.2653643, %v481_v55 }
  0xba   : > { %v1210_v59 = vpop.eup %1209  ;;  %v920_v60 = vsel %vm1810_vm3, %v864_v56, 0.0  ;;  %v545_v61 = vsel %vm529_vm8, 0.01321171, %v513_v58  ;;  %vm593_vm10 = vcmp.eq.f32.partialorder %v397_v46, 4.0  ;;  %vm625_vm11 = vcmp.eq.f32.partialorder %v397_v46, 5.0 }
  0xbb   : > { %936 = vst [vmem:[%s1749_s23 + $0x18] sm:$0xff] %v920_v60  ;;  %v449_v62 = vadd.f32 -0.32665175, %v433_v17  ;;  %v577_v63 = vsel %vm561_vm9, 8.90198e-05, %v545_v61  ;;  %vm657_vm13 = vcmp.eq.f32.partialorder %v397_v46, 6.0  ;;  %v398_v0 = vcvt.s32.f32 %v382_v48 }
  0xbc   : > { %v1212_v1 = vpop.eup %1211  ;;  %v609_v2 = vsel %vm593_vm10, 8.117555e-08, %v577_v63  ;;  %vm689_vm14 = vcmp.eq.f32.partialorder %v397_v46, 7.0  ;;  %vm721_vm12 = vcmp.eq.f32.partialorder %v397_v46, 8.0  ;;  %vm753_vm15 = vcmp.eq.f32.partialorder %v397_v46, 9.0 }
  0xbd   : > { %v641_v3 = vsel %vm625_vm11, 1.0017859e-11, %v609_v2  ;;  %vm785_vm0 = vcmp.eq.f32.partialorder %v397_v46, 10.0  ;;  %v833_v4 = vsub.f32 %v449_v62, %v350_v57  ;;  %vm1828_vm1 = vcmp.ne.s32.totalorder %v889_v50, 0 }
  0xbe   : > { %v673_v6 = vsel %vm657_vm13, 1.6731528e-16, %v641_v3  ;;  %v352_v9 = vmul.f32 0.6931472, %v1210_v59  ;;  %v418_v10 = vmul.f32 %v398_v0, %v398_v0  ;;  %vm466_vm2 = vcmp.eq.f32.partialorder %v398_v0, 0.0 }
  0xbf   : > { %v705_v11 = vsel %vm689_vm14, 3.7818767e-22, %v673_v6  ;;  %v482_v12 = vsel %vm466_vm2, 0.72133493, %v1441_v19  ;;  %vm498_vm3 = vcmp.eq.f32.partialorder %v398_v0, 1.0  ;;  %vm530_vm4 = vcmp.eq.f32.partialorder %v398_v0, 2.0 }
  0xc0   : > { %v737_v13 = vsel %vm721_vm12, 1.1568848e-28, %v705_v11  ;;  %v434_v14 = vmul.f32 -1.0, %v418_v10  ;;  %v514_v18 = vsel %vm498_vm3, 0.2653643, %v482_v12  ;;  %vm562_vm5 = vcmp.eq.f32.partialorder %v398_v0, 3.0 }
  0xc1   : > { %v769_v20 = vsel %vm753_vm15, 4.789431e-36, %v737_v13  ;;  %v546_v16 = vsel %vm530_vm4, 0.01321171, %v514_v18  ;;  %vm594_vm6 = vcmp.eq.f32.partialorder %v398_v0, 4.0  ;;  %vm626_vm7 = vcmp.eq.f32.partialorder %v398_v0, 5.0 }
  0xc2   : > { %v801_v21 = vsel %vm785_vm0, 2.7e-44, %v769_v20  ;;  %v450_v22 = vadd.f32 -0.32665175, %v434_v14  ;;  %v578_v23 = vsel %vm562_vm5, 8.90198e-05, %v546_v16  ;;  %vm658_vm8 = vcmp.eq.f32.partialorder %v398_v0, 6.0 }
  0xc3   : > { %vm817_vm9 = vcmp.gt.f32.partialorder %v801_v21, 0.0  ;;  %v849_v24 = vmul.f32 %v833_v4, %v801_v21  ;;  %v610_v25 = vsel %vm594_vm6, 8.117555e-08, %v578_v23  ;;  %vm690_vm10 = vcmp.eq.f32.partialorder %v398_v0, 7.0  ;;  %v411_v21 = vld [vmem:[%s1692_s11 + $0x10] sm:$0xff] }
  0xc4   : > { %v642_v27 = vsel %vm626_vm7, 1.0017859e-11, %v610_v25  ;;  %vm722_vm11 = vcmp.eq.f32.partialorder %v398_v0, 8.0  ;;  %vm754_vm13 = vcmp.eq.f32.partialorder %v398_v0, 9.0  ;;  %vm786_vm14 = vcmp.eq.f32.partialorder %v398_v0, 10.0 }
  0xc5   : > { %v865_v29 = vsel %vm817_vm9, %v849_v24, 0.0  ;;  %v674_v30 = vsel %vm658_vm8, 1.6731528e-16, %v642_v27  ;;  %v834_v31 = vsub.f32 %v450_v22, %v352_v9  ;;  %vm1840_vm12 = vcmp.ne.s32.totalorder %v890_v51, 0 }
  0xc6   : > { %v921_v32 = vsel %vm1828_vm1, %v865_v29, 0.0  ;;  %v706_v33 = vsel %vm690_vm10, 3.7818767e-22, %v674_v30  ;;  %v383_v35 = vunpack.c.2.s8 %v1788_v26  ;;  %v1850_v38 = vmul.f32 0.6931472, %v1212_v1 }
  0xc7   : > { %937 = vst [vmem:[%s1749_s23 + $0x20] sm:$0xff] %v921_v32  ;;  %v738_v37 = vsel %vm722_vm11, 1.1568848e-28, %v706_v33  ;;  %1213 = vlog2.f32 %v332_v28  ;;  %v384_v39 = vunpack.c.3.s8 %v1788_v26  ;;  %v891_v42 = vunpack.c.2.s8 %v1817_v47 }
  0xc8   : > { %v770_v40 = vsel %vm754_vm13, 4.789431e-36, %v738_v37  ;;  %v399_v41 = vcvt.s32.f32 %v383_v35  ;;  %v892_v43 = vunpack.c.3.s8 %v1817_v47  ;;  %1215 = vlog2.f32 %v333_v36 }
  0xc9   : > { %v802_v44 = vsel %vm786_vm14, 2.7e-44, %v770_v40  ;;  %v1857_v45 = vcvt.s32.f32 %v384_v39  ;;  %v385_v8 = vunpack.c.0.s8 %v1847_v15  ;;  %vm1864_vm8 = vcmp.ne.s32.totalorder %v891_v42, 0  ;;  %v334_v39 = vld [vmem:[%s1676_s5 + $0x48] sm:$0xff]  ;;  %v335_v42 = vld [vmem:[%s1676_s5 + $0x50] sm:$0xff] }
  0xca   : > { %vm818_vm15 = vcmp.gt.f32.partialorder %v802_v44, 0.0  ;;  %v850_v46 = vmul.f32 %v834_v31, %v802_v44  ;;  %v419_v48 = vmul.f32 %v399_v41, %v399_v41  ;;  %vm467_vm0 = vcmp.eq.f32.partialorder %v399_v41, 0.0 }
  0xcb   : > { %v483_v26 = vsel %vm467_vm0, 0.72133493, %v1441_v19  ;;  %vm499_vm1 = vcmp.eq.f32.partialorder %v399_v41, 1.0  ;;  %vm531_vm2 = vcmp.eq.f32.partialorder %v399_v41, 2.0  ;;  %vm563_vm3 = vcmp.eq.f32.partialorder %v399_v41, 3.0 }
  0xcc   : > { %v866_v49 = vsel %vm818_vm15, %v850_v46, 0.0  ;;  %v435_v50 = vmul.f32 -1.0, %v419_v48  ;;  %v515_v51 = vsel %vm499_vm1, 0.2653643, %v483_v26  ;;  %vm595_vm4 = vcmp.eq.f32.partialorder %v399_v41, 4.0 }
  0xcd   : > { %v1214_v52 = vpop.eup %1213  ;;  %v922_v53 = vsel %vm1840_vm12, %v866_v49, 0.0  ;;  %v547_v54 = vsel %vm531_vm2, 0.01321171, %v515_v51  ;;  %vm627_vm5 = vcmp.eq.f32.partialorder %v399_v41, 5.0  ;;  %vm659_vm6 = vcmp.eq.f32.partialorder %v399_v41, 6.0  ;;  %v336_v49 = vld [vmem:[%s1676_s5 + $0x58] sm:$0xff] }
  0xce   : > { %938 = vst [vmem:[%s1749_s23 + $0x28] sm:$0xff] %v922_v53  ;;  %v451_v55 = vadd.f32 -0.32665175, %v435_v50  ;;  %v579_v56 = vsel %vm563_vm3, 8.90198e-05, %v547_v54  ;;  %vm691_vm7 = vcmp.eq.f32.partialorder %v399_v41, 7.0  ;;  %v420_v17 = vmul.f32 %v1857_v45, %v1857_v45  ;;  %v1216_v58 = vpop.eup %1215 }
  0xcf   : > { %v611_v59 = vsel %vm595_vm4, 8.117555e-08, %v579_v56  ;;  %vm723_vm9 = vcmp.eq.f32.partialorder %v399_v41, 8.0  ;;  %vm755_vm10 = vcmp.eq.f32.partialorder %v399_v41, 9.0  ;;  %vm787_vm11 = vcmp.eq.f32.partialorder %v399_v41, 10.0 }
  0xd0   : > { %v643_v60 = vsel %vm627_vm5, 1.0017859e-11, %v611_v59  ;;  %v835_v61 = vsub.f32 %v451_v55, %v1850_v38  ;;  %v356_v62 = vmul.f32 0.6931472, %v1214_v52  ;;  %v436_v63 = vmul.f32 -1.0, %v420_v17 }
  0xd1   : > { %v675_v0 = vsel %vm659_vm6, 1.6731528e-16, %v643_v60  ;;  %vm468_vm13 = vcmp.eq.f32.partialorder %v1857_v45, 0.0  ;;  %vm500_vm14 = vcmp.eq.f32.partialorder %v1857_v45, 1.0  ;;  %vm532_vm12 = vcmp.eq.f32.partialorder %v1857_v45, 2.0 }
  0xd2   : > { %v707_v1 = vsel %vm691_vm7, 3.7818767e-22, %v675_v0  ;;  %v452_v2 = vadd.f32 -0.32665175, %v436_v63  ;;  %v484_v3 = vsel %vm468_vm13, 0.72133493, %v1441_v19  ;;  %v1877_v4 = vcvt.s32.f32 %v385_v8 }
  0xd3   : > { %v739_v5 = vsel %vm723_vm9, 1.1568848e-28, %v707_v1  ;;  %v516_v6 = vsel %vm500_vm14, 0.2653643, %v484_v3  ;;  %vm564_vm15 = vcmp.eq.f32.partialorder %v1857_v45, 3.0  ;;  %vm596_vm0 = vcmp.eq.f32.partialorder %v1857_v45, 4.0 }
  0xd4   : > { %v771_v9 = vsel %vm755_vm10, 4.789431e-36, %v739_v5  ;;  %v548_v10 = vsel %vm532_vm12, 0.01321171, %v516_v6  ;;  %vm628_vm1 = vcmp.eq.f32.partialorder %v1857_v45, 5.0  ;;  %vm660_vm2 = vcmp.eq.f32.partialorder %v1857_v45, 6.0 }
  0xd5   : > { %v803_v11 = vsel %vm787_vm11, 2.7e-44, %v771_v9  ;;  %v580_v12 = vsel %vm564_vm15, 8.90198e-05, %v548_v10  ;;  %vm692_vm3 = vcmp.eq.f32.partialorder %v1857_v45, 7.0  ;;  %vm724_vm4 = vcmp.eq.f32.partialorder %v1857_v45, 8.0 }
  0xd6   : > { %vm819_vm5 = vcmp.gt.f32.partialorder %v803_v11, 0.0  ;;  %v851_v13 = vmul.f32 %v835_v61, %v803_v11  ;;  %v612_v14 = vsel %vm596_vm0, 8.117555e-08, %v580_v12  ;;  %vm756_vm6 = vcmp.eq.f32.partialorder %v1857_v45, 9.0 }
  0xd7   : > { %v644_v18 = vsel %vm628_vm1, 1.0017859e-11, %v612_v14  ;;  %vm788_vm7 = vcmp.eq.f32.partialorder %v1857_v45, 10.0  ;;  %v836_v20 = vsub.f32 %v452_v2, %v356_v62  ;;  %vm1891_vm9 = vcmp.ne.s32.totalorder %v892_v43, 0 }
  0xd8   : > { %v867_v22 = vsel %vm819_vm5, %v851_v13, 0.0  ;;  %v676_v23 = vsel %vm660_vm2, 1.6731528e-16, %v644_v18  ;;  %v358_v24 = vmul.f32 0.6931472, %v1216_v58  ;;  %v421_v25 = vmul.f32 %v1877_v4, %v1877_v4 }
  0xd9   : > { %v923_v27 = vsel %vm1864_vm8, %v867_v22, 0.0  ;;  %v708_v28 = vsel %vm692_vm3, 3.7818767e-22, %v676_v23  ;;  %vm469_vm10 = vcmp.eq.f32.partialorder %v1877_v4, 0.0  ;;  %vm501_vm11 = vcmp.eq.f32.partialorder %v1877_v4, 1.0 }
  0xda   : > { %939 = vst [vmem:[%s1749_s23 + $0x30] sm:$0xff] %v923_v27  ;;  %v740_v47 = vsel %vm724_vm4, 1.1568848e-28, %v708_v28  ;;  %v437_v29 = vmul.f32 -1.0, %v421_v25  ;;  %v485_v30 = vsel %vm469_vm10, 0.72133493, %v1441_v19  ;;  %vm879_vm13 = vnez %v411_v21 }
  0xdb   : > { %v772_v31 = vsel %vm756_vm6, 4.789431e-36, %v740_v47  ;;  %v517_v32 = vsel %vm501_vm11, 0.2653643, %v485_v30  ;;  %vm533_vm8 = vcmp.eq.f32.partialorder %v1877_v4, 2.0  ;;  %vm565_vm14 = vcmp.eq.f32.partialorder %v1877_v4, 3.0 }
  0xdc   : > { %v804_v33 = vsel %vm788_vm7, 2.7e-44, %v772_v31  ;;  %v453_v34 = vadd.f32 -0.32665175, %v437_v29  ;;  %v549_v35 = vsel %vm533_vm8, 0.01321171, %v517_v32  ;;  %vm597_vm12 = vcmp.eq.f32.partialorder %v1877_v4, 4.0 }
  0xdd   : > { %vm820_vm15 = vcmp.gt.f32.partialorder %v804_v33, 0.0  ;;  %v852_v36 = vmul.f32 %v836_v20, %v804_v33  ;;  %v581_v37 = vsel %vm565_vm14, 8.90198e-05, %v549_v35  ;;  %vm629_vm0 = vcmp.eq.f32.partialorder %v1877_v4, 5.0  ;;  %v337_v35 = vld [vmem:[%s1676_s5 + $0x60] sm:$0xff] }
  0xde   : > { %v613_v38 = vsel %vm597_vm12, 8.117555e-08, %v581_v37  ;;  %vm661_vm1 = vcmp.eq.f32.partialorder %v1877_v4, 6.0  ;;  %vm693_vm2 = vcmp.eq.f32.partialorder %v1877_v4, 7.0  ;;  %vm725_vm3 = vcmp.eq.f32.partialorder %v1877_v4, 8.0 }
  0xdf   : > { %v868_v40 = vsel %vm820_vm15, %v852_v36, 0.0  ;;  %v645_v41 = vsel %vm629_vm0, 1.0017859e-11, %v613_v38  ;;  %vm757_vm4 = vcmp.eq.f32.partialorder %v1877_v4, 9.0  ;;  %vm789_vm5 = vcmp.eq.f32.partialorder %v1877_v4, 10.0  ;;  %v412_v36 = vld [vmem:[%s1692_s11 + $0x18] sm:$0xff] }
  0xe0   : > { %v924_v43 = vsel %vm1891_vm9, %v868_v40, 0.0  ;;  %v677_v44 = vsel %vm661_vm1, 1.6731528e-16, %v645_v41  ;;  %v837_v45 = vsub.f32 %v453_v34, %v358_v24  ;;  %v1927_v8 = vsel %vm879_vm13, 16843009, %v1440_v7 }
  0xe1   : > { %940 = vst [vmem:[%s1749_s23 + $0x38] sm:$0xff] %v924_v43  ;;  %v709_v46 = vsel %vm693_vm2, 3.7818767e-22, %v677_v44  ;;  %v893_v48 = vunpack.c.0.s8 %v1927_v8  ;;  %1217 = vlog2.f32 %v334_v39  ;;  %v386_v26 = vunpack.c.1.s8 %v1847_v15 }
  0xe2   : > { %v741_v50 = vsel %vm725_vm3, 1.1568848e-28, %v709_v46  ;;  %1219 = vlog2.f32 %v335_v42  ;;  %v387_v51 = vunpack.c.2.s8 %v1847_v15  ;;  %v894_v55 = vunpack.c.1.s8 %v1927_v8 }
  0xe3   : > { %v773_v52 = vsel %vm757_vm4, 4.789431e-36, %v741_v50  ;;  %vm1938_vm6 = vcmp.ne.s32.totalorder %v893_v48, 0  ;;  %v402_v54 = vcvt.s32.f32 %v386_v26  ;;  %v895_v17 = vunpack.c.2.s8 %v1927_v8 }
  0xe4   : > { %v805_v56 = vsel %vm789_vm5, 2.7e-44, %v773_v52  ;;  %v1945_v57 = vcvt.s32.f32 %v387_v51  ;;  %1221 = vlog2.f32 %v336_v49  ;;  %vm1952_vm15 = vcmp.ne.s32.totalorder %v894_v55, 0 }
  0xe5   : > { %vm821_vm7 = vcmp.gt.f32.partialorder %v805_v56, 0.0  ;;  %v853_v58 = vmul.f32 %v837_v45, %v805_v56  ;;  %v422_v59 = vmul.f32 %v402_v54, %v402_v54  ;;  %vm470_vm9 = vcmp.eq.f32.partialorder %v402_v54, 0.0 }
  0xe6   : > { %v486_v60 = vsel %vm470_vm9, 0.72133493, %v1441_v19  ;;  %vm502_vm10 = vcmp.eq.f32.partialorder %v402_v54, 1.0  ;;  %vm534_vm11 = vcmp.eq.f32.partialorder %v402_v54, 2.0  ;;  %vm566_vm13 = vcmp.eq.f32.partialorder %v402_v54, 3.0 }
  0xe7   : > { %v1218_v61 = vpop.eup %1217  ;;  %v869_v62 = vsel %vm821_vm7, %v853_v58, 0.0  ;;  %v438_v63 = vmul.f32 -1.0, %v422_v59  ;;  %v518_v0 = vsel %vm502_vm10, 0.2653643, %v486_v60  ;;  %vm598_vm8 = vcmp.eq.f32.partialorder %v402_v54, 4.0  ;;  %v338_v59 = vld [vmem:[%s1676_s5 + $0x68] sm:$0xff] }
  0xe8   : > { %v1220_v1 = vpop.eup %1219  ;;  %v925_v2 = vsel %vm1938_vm6, %v869_v62, 0.0  ;;  %v360_v3 = vmul.f32 0.6931472, %v1218_v61  ;;  %v550_v4 = vsel %vm534_vm11, 0.01321171, %v518_v0  ;;  %vm630_vm14 = vcmp.eq.f32.partialorder %v402_v54, 5.0 }
  0xe9   : > { %941 = vst [vmem:[%s1749_s23 + $0x40] sm:$0xff] %v925_v2  ;;  %v454_v5 = vadd.f32 -0.32665175, %v438_v63  ;;  %v582_v6 = vsel %vm566_vm13, 8.90198e-05, %v550_v4  ;;  %vm662_vm12 = vcmp.eq.f32.partialorder %v402_v54, 6.0  ;;  %v423_v10 = vmul.f32 %v1945_v57, %v1945_v57 }
  0xea   : > { %v1222_v11 = vpop.eup %1221  ;;  %v614_v12 = vsel %vm598_vm8, 8.117555e-08, %v582_v6  ;;  %vm694_vm0 = vcmp.eq.f32.partialorder %v402_v54, 7.0  ;;  %vm726_vm1 = vcmp.eq.f32.partialorder %v402_v54, 8.0  ;;  %vm758_vm2 = vcmp.eq.f32.partialorder %v402_v54, 9.0 }
  0xeb   : > { %v646_v13 = vsel %vm630_vm14, 1.0017859e-11, %v614_v12  ;;  %vm790_vm3 = vcmp.eq.f32.partialorder %v402_v54, 10.0  ;;  %v838_v14 = vsub.f32 %v454_v5, %v360_v3  ;;  %v362_v18 = vmul.f32 0.6931472, %v1220_v1 }
  0xec   : > { %v678_v20 = vsel %vm662_vm12, 1.6731528e-16, %v646_v13  ;;  %v439_v16 = vmul.f32 -1.0, %v423_v10  ;;  %vm471_vm4 = vcmp.eq.f32.partialorder %v1945_v57, 0.0  ;;  %vm503_vm5 = vcmp.eq.f32.partialorder %v1945_v57, 1.0 }
  0xed   : > { %v710_v21 = vsel %vm694_vm0, 3.7818767e-22, %v678_v20  ;;  %v487_v22 = vsel %vm471_vm4, 0.72133493, %v1441_v19  ;;  %vm535_vm6 = vcmp.eq.f32.partialorder %v1945_v57, 2.0  ;;  %vm567_vm7 = vcmp.eq.f32.partialorder %v1945_v57, 3.0 }
  0xee   : > { %v742_v23 = vsel %vm726_vm1, 1.1568848e-28, %v710_v21  ;;  %v455_v24 = vadd.f32 -0.32665175, %v439_v16  ;;  %v519_v25 = vsel %vm503_vm5, 0.2653643, %v487_v22  ;;  %v388_v27 = vunpack.c.3.s8 %v1847_v15 }
  0xef   : > { %v774_v28 = vsel %vm758_vm2, 4.789431e-36, %v742_v23  ;;  %v551_v47 = vsel %vm535_vm6, 0.01321171, %v519_v25  ;;  %vm599_vm9 = vcmp.eq.f32.partialorder %v1945_v57, 4.0  ;;  %vm631_vm10 = vcmp.eq.f32.partialorder %v1945_v57, 5.0 }
  0xf0   : > { %v806_v29 = vsel %vm790_vm3, 2.7e-44, %v774_v28  ;;  %v583_v30 = vsel %vm567_vm7, 8.90198e-05, %v551_v47  ;;  %vm663_vm11 = vcmp.eq.f32.partialorder %v1945_v57, 6.0  ;;  %vm695_vm13 = vcmp.eq.f32.partialorder %v1945_v57, 7.0  ;;  %v1972_v15 = vld [vmem:[%s1684_s10 + $0x18] sm:$0xff] }
  0xf1   : > { %vm822_vm8 = vcmp.gt.f32.partialorder %v806_v29, 0.0  ;;  %v854_v31 = vmul.f32 %v838_v14, %v806_v29  ;;  %v615_v32 = vsel %vm599_vm9, 8.117555e-08, %v583_v30  ;;  %vm727_vm14 = vcmp.eq.f32.partialorder %v1945_v57, 8.0 }
  0xf2   : > { %v647_v33 = vsel %vm631_vm10, 1.0017859e-11, %v615_v32  ;;  %vm759_vm12 = vcmp.eq.f32.partialorder %v1945_v57, 9.0  ;;  %vm791_vm0 = vcmp.eq.f32.partialorder %v1945_v57, 10.0  ;;  %v839_v34 = vsub.f32 %v455_v24, %v362_v18  ;;  %v339_v24 = vld [vmem:[%s1676_s5 + $0x70] sm:$0xff] }
  0xf3   : > { %v870_v37 = vsel %vm822_vm8, %v854_v31, 0.0  ;;  %v679_v38 = vsel %vm663_vm11, 1.6731528e-16, %v647_v33  ;;  %vm1980_vm1 = vcmp.ne.s32.totalorder %v895_v17, 0  ;;  %v1984_v40 = vmul.f32 0.6931472, %v1222_v11 }
  0xf4   : > { %v926_v41 = vsel %vm1952_vm15, %v870_v37, 0.0  ;;  %v711_v42 = vsel %vm695_vm13, 3.7818767e-22, %v679_v38  ;;  %v404_v43 = vcvt.s32.f32 %v388_v27  ;;  %v896_v44 = vunpack.c.3.s8 %v1927_v8 }
  0xf5   : > { %942 = vst [vmem:[%s1749_s23 + $0x48] sm:$0xff] %v926_v41  ;;  %v743_v45 = vsel %vm727_vm14, 1.1568848e-28, %v711_v42  ;;  %1223 = vlog2.f32 %v337_v35  ;;  %v389_v46 = vunpack.c.0.s8 %v1972_v15  ;;  %vm880_vm2 = vnez %v412_v36 }
  0xf6   : > { %v775_v48 = vsel %vm759_vm12, 4.789431e-36, %v743_v45  ;;  %v424_v26 = vmul.f32 %v404_v43, %v404_v43  ;;  %vm472_vm3 = vcmp.eq.f32.partialorder %v404_v43, 0.0  ;;  %vm504_vm15 = vcmp.eq.f32.partialorder %v404_v43, 1.0 }
  0xf7   : > { %v807_v49 = vsel %vm791_vm0, 2.7e-44, %v775_v48  ;;  %v488_v50 = vsel %vm472_vm3, 0.72133493, %v1441_v19  ;;  %vm536_vm4 = vcmp.eq.f32.partialorder %v404_v43, 2.0  ;;  %vm568_vm5 = vcmp.eq.f32.partialorder %v404_v43, 3.0 }
  0xf8   : > { %vm823_vm6 = vcmp.gt.f32.partialorder %v807_v49, 0.0  ;;  %v855_v8 = vmul.f32 %v839_v34, %v807_v49  ;;  %v440_v51 = vmul.f32 -1.0, %v424_v26  ;;  %v520_v52 = vsel %vm504_vm15, 0.2653643, %v488_v50  ;;  %v340_v49 = vld [vmem:[%s1676_s5 + $0x78] sm:$0xff] }
  0xf9   : > { %v552_v53 = vsel %vm536_vm4, 0.01321171, %v520_v52  ;;  %vm600_vm7 = vcmp.eq.f32.partialorder %v404_v43, 4.0  ;;  %vm632_vm9 = vcmp.eq.f32.partialorder %v404_v43, 5.0  ;;  %vm664_vm10 = vcmp.eq.f32.partialorder %v404_v43, 6.0 }
  0xfa   : > { %v871_v54 = vsel %vm823_vm6, %v855_v8, 0.0  ;;  %v456_v55 = vadd.f32 -0.32665175, %v440_v51  ;;  %v584_v56 = vsel %vm568_vm5, 8.90198e-05, %v552_v53  ;;  %vm696_vm11 = vcmp.eq.f32.partialorder %v404_v43, 7.0 }
  0xfb   : > { %v1224_v57 = vpop.eup %1223  ;;  %v927_v17 = vsel %vm1980_vm1, %v871_v54, 0.0  ;;  %v616_v58 = vsel %vm600_vm7, 8.117555e-08, %v584_v56  ;;  %vm728_vm13 = vcmp.eq.f32.partialorder %v404_v43, 8.0  ;;  %vm760_vm8 = vcmp.eq.f32.partialorder %v404_v43, 9.0 }
  0xfc   : > { %943 = vst [vmem:[%s1749_s23 + $0x50] sm:$0xff] %v927_v17  ;;  %v648_v60 = vsel %vm632_vm9, 1.0017859e-11, %v616_v58  ;;  %vm792_vm14 = vcmp.eq.f32.partialorder %v404_v43, 10.0  ;;  %v840_v61 = vsub.f32 %v456_v55, %v1984_v40  ;;  %vm2005_vm12 = vcmp.ne.s32.totalorder %v896_v44, 0 }
  0xfd   : > { %v680_v63 = vsel %vm664_vm10, 1.6731528e-16, %v648_v60  ;;  %v366_v0 = vmul.f32 0.6931472, %v1224_v57  ;;  %v405_v1 = vcvt.s32.f32 %v389_v46  ;;  %v2012_v2 = vsel %vm880_vm2, 16843009, %v1440_v7 }
  0xfe   : > { %v712_v3 = vsel %vm696_vm11, 3.7818767e-22, %v680_v63  ;;  %v897_v4 = vunpack.c.0.s8 %v2012_v2  ;;  %1225 = vlog2.f32 %v338_v59  ;;  %v390_v5 = vunpack.c.1.s8 %v1972_v15 }
  0xff   : > { %v744_v6 = vsel %vm728_vm13, 1.1568848e-28, %v712_v3  ;;  %v425_v9 = vmul.f32 %v405_v1, %v405_v1  ;;  %vm473_vm0 = vcmp.eq.f32.partialorder %v405_v1, 0.0  ;;  %vm505_vm1 = vcmp.eq.f32.partialorder %v405_v1, 1.0 }
 0x100   : > { %v776_v10 = vsel %vm760_vm8, 4.789431e-36, %v744_v6  ;;  %v489_v11 = vsel %vm473_vm0, 0.72133493, %v1441_v19  ;;  %vm537_vm3 = vcmp.eq.f32.partialorder %v405_v1, 2.0  ;;  %vm569_vm15 = vcmp.eq.f32.partialorder %v405_v1, 3.0 }
 0x101   : > { %v808_v7 = vsel %vm792_vm14, 2.7e-44, %v776_v10  ;;  %v441_v12 = vmul.f32 -1.0, %v425_v9  ;;  %v521_v13 = vsel %vm505_vm1, 0.2653643, %v489_v11  ;;  %vm601_vm2 = vcmp.eq.f32.partialorder %v405_v1, 4.0 }
 0x102   : > { %vm824_vm4 = vcmp.gt.f32.partialorder %v808_v7, 0.0  ;;  %v856_v14 = vmul.f32 %v840_v61, %v808_v7  ;;  %v553_v18 = vsel %vm537_vm3, 0.01321171, %v521_v13  ;;  %vm633_vm5 = vcmp.eq.f32.partialorder %v405_v1, 5.0 }
 0x103   : > { %v457_v20 = vadd.f32 -0.32665175, %v441_v12  ;;  %v585_v16 = vsel %vm569_vm15, 8.90198e-05, %v553_v18  ;;  %vm665_vm6 = vcmp.eq.f32.partialorder %v405_v1, 6.0  ;;  %vm697_vm7 = vcmp.eq.f32.partialorder %v405_v1, 7.0 }
 0x104   : > { %v1226_v21 = vpop.eup %1225  ;;  %v872_v22 = vsel %vm824_vm4, %v856_v14, 0.0  ;;  %v617_v23 = vsel %vm601_vm2, 8.117555e-08, %v585_v16  ;;  %vm729_vm9 = vcmp.eq.f32.partialorder %v405_v1, 8.0  ;;  %vm761_vm10 = vcmp.eq.f32.partialorder %v405_v1, 9.0 }
 0x105   : > { %v928_v25 = vsel %vm2005_vm12, %v872_v22, 0.0  ;;  %v649_v27 = vsel %vm633_vm5, 1.0017859e-11, %v617_v23  ;;  %vm793_vm11 = vcmp.eq.f32.partialorder %v405_v1, 10.0  ;;  %v841_v28 = vsub.f32 %v457_v20, %v366_v0 }
 0x106   : > { %944 = vst [vmem:[%s1749_s23 + $0x58] sm:$0xff] %v928_v25  ;;  %v681_v47 = vsel %vm665_vm6, 1.6731528e-16, %v649_v27  ;;  %vm2025_vm13 = vcmp.ne.s32.totalorder %v897_v4, 0  ;;  %v368_v30 = vmul.f32 0.6931472, %v1226_v21  ;;  %v406_v31 = vcvt.s32.f32 %v390_v5 }
 0x107   : > { %v713_v32 = vsel %vm697_vm7, 3.7818767e-22, %v681_v47  ;;  %v898_v33 = vunpack.c.1.s8 %v2012_v2  ;;  %1227 = vlog2.f32 %v339_v24  ;;  %v391_v34 = vunpack.c.2.s8 %v1972_v15 }
 0x108   : > { %v745_v35 = vsel %vm729_vm9, 1.1568848e-28, %v713_v32  ;;  %v426_v36 = vmul.f32 %v406_v31, %v406_v31  ;;  %vm474_vm8 = vcmp.eq.f32.partialorder %v406_v31, 0.0  ;;  %vm506_vm14 = vcmp.eq.f32.partialorder %v406_v31, 1.0 }
 0x109   : > { %v777_v37 = vsel %vm761_vm10, 4.789431e-36, %v745_v35  ;;  %v490_v38 = vsel %vm474_vm8, 0.72133493, %v1441_v19  ;;  %vm538_vm12 = vcmp.eq.f32.partialorder %v406_v31, 2.0  ;;  %vm570_vm0 = vcmp.eq.f32.partialorder %v406_v31, 3.0 }
 0x10a   : > { %v809_v39 = vsel %vm793_vm11, 2.7e-44, %v777_v37  ;;  %v442_v40 = vmul.f32 -1.0, %v426_v36  ;;  %v522_v41 = vsel %vm506_vm14, 0.2653643, %v490_v38  ;;  %vm602_vm1 = vcmp.eq.f32.partialorder %v406_v31, 4.0 }
 0x10b   : > { %vm825_vm3 = vcmp.gt.f32.partialorder %v809_v39, 0.0  ;;  %v857_v42 = vmul.f32 %v841_v28, %v809_v39  ;;  %v554_v43 = vsel %vm538_vm12, 0.01321171, %v522_v41  ;;  %vm634_vm15 = vcmp.eq.f32.partialorder %v406_v31, 5.0 }
 0x10c   : > { %v458_v44 = vadd.f32 -0.32665175, %v442_v40  ;;  %v586_v45 = vsel %vm570_vm0, 8.90198e-05, %v554_v43  ;;  %vm666_vm2 = vcmp.eq.f32.partialorder %v406_v31, 6.0  ;;  %vm698_vm4 = vcmp.eq.f32.partialorder %v406_v31, 7.0 }
 0x10d   : > { %v1228_v46 = vpop.eup %1227  ;;  %v873_v48 = vsel %vm825_vm3, %v857_v42, 0.0  ;;  %v618_v26 = vsel %vm602_vm1, 8.117555e-08, %v586_v45  ;;  %vm730_vm5 = vcmp.eq.f32.partialorder %v406_v31, 8.0  ;;  %vm762_vm6 = vcmp.eq.f32.partialorder %v406_v31, 9.0 }
 0x10e   : > { %v929_v50 = vsel %vm2025_vm13, %v873_v48, 0.0  ;;  %v650_v8 = vsel %vm634_vm15, 1.0017859e-11, %v618_v26  ;;  %vm794_vm7 = vcmp.eq.f32.partialorder %v406_v31, 10.0  ;;  %v842_v52 = vsub.f32 %v458_v44, %v368_v30 }
 0x10f   : > { %945 = vst [vmem:[%s1749_s23 + $0x60] sm:$0xff] %v929_v50  ;;  %v682_v51 = vsel %vm666_vm2, 1.6731528e-16, %v650_v8  ;;  %vm2040_vm9 = vcmp.ne.s32.totalorder %v898_v33, 0  ;;  %v407_v54 = vcvt.s32.f32 %v391_v34  ;;  %v370_v56 = vmul.f32 0.6931472, %v1228_v46 }
 0x110   : > { %v714_v55 = vsel %vm698_vm4, 3.7818767e-22, %v682_v51  ;;  %1229 = vlog2.f32 %v340_v49  ;;  %v392_v57 = vunpack.c.3.s8 %v1972_v15  ;;  %v899_v4 = vunpack.c.2.s8 %v2012_v2 }
 0x111   : > { %v746_v17 = vsel %vm730_vm5, 1.1568848e-28, %v714_v55  ;;  %v427_v58 = vmul.f32 %v407_v54, %v407_v54  ;;  %vm475_vm10 = vcmp.eq.f32.partialorder %v407_v54, 0.0  ;;  %vm507_vm11 = vcmp.eq.f32.partialorder %v407_v54, 1.0 }
 0x112   : > { %v778_v59 = vsel %vm762_vm6, 4.789431e-36, %v746_v17  ;;  %v491_v60 = vsel %vm475_vm10, 0.72133493, %v1441_v19  ;;  %vm539_vm13 = vcmp.eq.f32.partialorder %v407_v54, 2.0  ;;  %vm571_vm8 = vcmp.eq.f32.partialorder %v407_v54, 3.0 }
 0x113   : > { %v810_v61 = vsel %vm794_vm7, 2.7e-44, %v778_v59  ;;  %v443_v62 = vmul.f32 -1.0, %v427_v58  ;;  %v523_v63 = vsel %vm507_vm11, 0.2653643, %v491_v60  ;;  %vm603_vm14 = vcmp.eq.f32.partialorder %v407_v54, 4.0 }
 0x114   : > { %vm826_vm12 = vcmp.gt.f32.partialorder %v810_v61, 0.0  ;;  %v858_v0 = vmul.f32 %v842_v52, %v810_v61  ;;  %v555_v1 = vsel %vm539_vm13, 0.01321171, %v523_v63  ;;  %vm635_vm0 = vcmp.eq.f32.partialorder %v407_v54, 5.0 }
 0x115   : > { %v459_v15 = vadd.f32 -0.32665175, %v443_v62  ;;  %v587_v3 = vsel %vm571_vm8, 8.90198e-05, %v555_v1  ;;  %vm667_vm1 = vcmp.eq.f32.partialorder %v407_v54, 6.0  ;;  %vm699_vm3 = vcmp.eq.f32.partialorder %v407_v54, 7.0 }
 0x116   : > { %v1230_v5 = vpop.eup %1229  ;;  %v874_v6 = vsel %vm826_vm12, %v858_v0, 0.0  ;;  %v619_v9 = vsel %vm603_vm14, 8.117555e-08, %v587_v3  ;;  %vm731_vm15 = vcmp.eq.f32.partialorder %v407_v54, 8.0  ;;  %vm763_vm2 = vcmp.eq.f32.partialorder %v407_v54, 9.0 }
 0x117   : > { %v930_v10 = vsel %vm2040_vm9, %v874_v6, 0.0  ;;  %v651_v11 = vsel %vm635_vm0, 1.0017859e-11, %v619_v9  ;;  %vm795_vm4 = vcmp.eq.f32.partialorder %v407_v54, 10.0  ;;  %v408_v12 = vcvt.s32.f32 %v392_v57 }
 0x118   : > { %946 = vst [vmem:[%s1749_s23 + $0x68] sm:$0xff] %v930_v10  ;;  %v683_v7 = vsel %vm667_vm1, 1.6731528e-16, %v651_v11  ;;  %v843_v14 = vsub.f32 %v459_v15, %v370_v56  ;;  %vm2051_vm5 = vcmp.ne.s32.totalorder %v899_v4, 0  ;;  %v372_v20 = vmul.f32 0.6931472, %v1230_v5 }
 0x119   : > { %v715_v13 = vsel %vm699_vm3, 3.7818767e-22, %v683_v7  ;;  %v428_v21 = vmul.f32 %v408_v12, %v408_v12  ;;  %vm476_vm6 = vcmp.eq.f32.partialorder %v408_v12, 0.0  ;;  %vm508_vm7 = vcmp.eq.f32.partialorder %v408_v12, 1.0 }
 0x11a   : > { %v747_v16 = vsel %vm731_vm15, 1.1568848e-28, %v715_v13  ;;  %v492_v23 = vsel %vm476_vm6, 0.72133493, %v1441_v19  ;;  %vm540_vm9 = vcmp.eq.f32.partialorder %v408_v12, 2.0  ;;  %vm572_vm10 = vcmp.eq.f32.partialorder %v408_v12, 3.0 }
 0x11b   : > { %v779_v22 = vsel %vm763_vm2, 4.789431e-36, %v747_v16  ;;  %v444_v25 = vmul.f32 -1.0, %v428_v21  ;;  %v524_v27 = vsel %vm508_vm7, 0.2653643, %v492_v23  ;;  %vm604_vm11 = vcmp.eq.f32.partialorder %v408_v12, 4.0 }
 0x11c   : > { %v811_v24 = vsel %vm795_vm4, 2.7e-44, %v779_v22  ;;  %v556_v47 = vsel %vm540_vm9, 0.01321171, %v524_v27  ;;  %vm636_vm8 = vcmp.eq.f32.partialorder %v408_v12, 5.0  ;;  %vm668_vm14 = vcmp.eq.f32.partialorder %v408_v12, 6.0 }
 0x11d   : > { %vm827_vm13 = vcmp.gt.f32.partialorder %v811_v24, 0.0  ;;  %v859_v28 = vmul.f32 %v843_v14, %v811_v24  ;;  %v460_v29 = vadd.f32 -0.32665175, %v444_v25  ;;  %v588_v30 = vsel %vm572_vm10, 8.90198e-05, %v556_v47 }
 0x11e   : > { %v620_v32 = vsel %vm604_vm11, 8.117555e-08, %v588_v30  ;;  %vm700_vm12 = vcmp.eq.f32.partialorder %v408_v12, 7.0  ;;  %vm732_vm0 = vcmp.eq.f32.partialorder %v408_v12, 8.0  ;;  %vm764_vm1 = vcmp.eq.f32.partialorder %v408_v12, 9.0 }
 0x11f   : > { %v875_v31 = vsel %vm827_vm13, %v859_v28, 0.0  ;;  %v652_v33 = vsel %vm636_vm8, 1.0017859e-11, %v620_v32  ;;  %vm796_vm3 = vcmp.eq.f32.partialorder %v408_v12, 10.0  ;;  %v844_v36 = vsub.f32 %v460_v29, %v372_v20 }
 0x120   : > { %v931_v19 = vsel %vm2051_vm5, %v875_v31, 0.0  ;;  %v684_v34 = vsel %vm668_vm14, 1.6731528e-16, %v652_v33  ;;  %v900_v37 = vunpack.c.3.s8 %v2012_v2 }
 0x121   : > { %947 = vst [vmem:[%s1749_s23 + $0x70] sm:$0xff] %v931_v19  ;;  %v716_v35 = vsel %vm700_vm12, 3.7818767e-22, %v684_v34 }
 0x122   : > { %v748_v38 = vsel %vm732_vm0, 1.1568848e-28, %v716_v35  ;;  %vm916_vm2 = vcmp.ne.s32.totalorder %v900_v37, 0 }
 0x123   : > { %v780_v39 = vsel %vm764_vm1, 4.789431e-36, %v748_v38 }
 0x124   : > { %v812_v40 = vsel %vm796_vm3, 2.7e-44, %v780_v39 }
 0x125   : > { %vm828_vm15 = vcmp.gt.f32.partialorder %v812_v40, 0.0  ;;  %v860_v41 = vmul.f32 %v844_v36, %v812_v40  ;;  %956 = sbr.rel (!%p1513_p9) target bundleno = 329 (0x149), region = 48 }
 0x127   : > { %v876_v42 = vsel %vm828_vm15, %v860_v41, 0.0 }
 0x128   : > { %v932_v43 = vsel %vm916_vm2, %v876_v42, 0.0 }
 0x129   : > { %948 = vst [vmem:[%s1749_s23 + $0x78] sm:$0xff] %v932_v43 }
 0x12a   : > { %s2180_s7 = smov (!%p959_p6, %s958_s7), 4 }
 0x12b   : > { %s1145_s17 = sshll.u32 %s2180_s7, 5 }
 0x12c   : > { %s963_s29 = ssub.s32 128, %s1145_s17 }
 0x12d   : > { %s964_s20 = sshll.u32 %s963_s29, 4 }
 0x12e   : > { %965 = vsyncadd %s950_s22, %s964_s20  ;;  %p2070_p5 = scmp.ne.s32.totalorder %s1145_s17, 0  ;;  %s1147_s19 = sshll.u32 %s1486_s16, 7 }
 0x12f   : > { %s969_s30 = scalar_lea.hbm %s2127_s3, %s1147_s19  ;;  %s971_s5 = sshll.u32 %s1749_s23, 4  ;;  %s2079_s5 = int_to_ptr.vmem [resolvable:$true] %s971_s5 }
 0x130   : > { %s973_s6 = sshll.u32 %s969_s30, 4  ;;  %s1133_s9 = sshll.u32 %s2180_s7, 9  ;;  %s2081_s6 = int_to_ptr.hbm [resolvable:$true] %s973_s6 }
 0x131   : > { %s1348_s8 = sshra.s32 %s2079_s5, 4  ;;  %s1350_s10 = sshrl.u32 %s1133_s9, 4  ;;  %s1349_s8 = int_to_ptr.vmem [resolvable:$true] %s1348_s8 }
 0x132   : > { %s1355_s11 = scalar_lea.vmem %s1349_s8, %s1350_s10  ;;  %s1442_s16 = smov [#allocation8]  }
 0x133   : > { %p1356_p9 = scmp.ne.s32.totalorder %s1349_s8, %s1355_s11  ;;  %s1359_s28 = scalar_lea.vmem %s1442_s16, 256 }
 0x134   : > { %p1361_p1 = scmp.lt.s32.totalorder %s1359_s28, %s1355_s11 }
 0x135   : > { %p1357_p12 = pnand %p1356_p9, %p2070_p5 }
 0x137   : > { %p1358_p0 = pneg %p1357_p12 }
 0x139   : > { %p1363_p10 = pnand %p1361_p1, %p1358_p0 }
 0x13b   : > { %1366 = shalt.err (!%p1363_p10)
}
 0x13c   : > { %s1367_s23 = sshra.s32 %s2081_s6, 4  ;;  %s1378_s19 = scalar_lea.hbm %s2127_s3, 224  ;;  %s1368_s23 = int_to_ptr.hbm [resolvable:$true] %s1367_s23 }
 0x13d   : > { %s1374_s17 = scalar_lea.hbm %s1368_s23, %s1350_s10  ;;  %p1379_p11 = scmp.lt.s32.totalorder %s1368_s23, %s2127_s3 }
 0x13e   : > { %p1375_p13 = scmp.ne.s32.totalorder %s1368_s23, %s1374_s17  ;;  %p1380_p4 = scmp.lt.s32.totalorder %s1378_s19, %s1374_s17 }
 0x140   : > { %p1376_p2 = pnand %p1375_p13, %p2070_p5  ;;  %p1381_p7 = por %p1380_p4, %p1379_p11 }
 0x142   : > { %p1377_p3 = pneg %p1376_p2 }
 0x144   : > { %p1382_p8 = pnand %p1381_p7, %p1377_p3 }
 0x146   : > { %1385 = shalt.err (!%p1382_p8)
}
 0x147   : > { %s1443_s30 = smov 512   ;;  %s1444_s8 = smov 32  }
 0x148   : > { %979 = dma.vmem_to_hbm [thread:$0]  (%p2070_p5), %s2079_s5, %s1133_s9, %s2081_s6, %s950_s22, %s1443_s30, %s1443_s30, %s1444_s8  }
 0x149 PF: > { %s988_s10 = sand.u32 1, %s1417_s12   ;;  %p2167_p6 = scmp.ne.s32.totalorder %s2132_s25, 0 }
 0x14a   : > { %p2168_p9 = scmp.ge.s32.totalorder %s1429_s15, 2  ;;  %s989_s11 = scalar_lea.sflag [#allocation4], %s988_s10 }
 0x14c   : > { %p1153_p12 = pnand %p2168_p9, %p2167_p6 }
 0x14e   : > { %p1154_p0 = pneg %p1153_p12 }
 0x150   : > { %1412 = dma.done.wait (%p1154_p0), %s989_s11, 2048  }
 0x151   : > { %1414 = vsyncadd (%p1154_p0), %s989_s11, 4294965248  ;;  %p19_p1 = scmp.ge.s32.totalorder %s1490_s18, 4   ;;  %s2169_s12 = smov %s1421_s13 }
 0x152   : > { %s2170_s13 = smov %s1425_s14  ;;  %s2171_s14 = smov %s1502_s21 }
 0x153   : > { %s2172_s15 = smov %s1490_s18  ;;  %21 = sbr.rel (!%p19_p1) target bundleno = 7 (0x7), region = 101 }
 0x158   :  { %995 = vsyncpa [#allocation3], 1 }
 0x159   :  { %997 = vsyncpa [#allocation3 + $0x1], 1 }
 0x15a   :  { %998 = vsyncpa [#allocation6], 1 }
 0x15b   :  { %1000 = vsyncpa [#allocation6 + $0x1], 1 }
 0x15c   :  { %1001 = vsyncpa [#allocation4], 1 }
 0x15d   :  { %1003 = vsyncpa [#allocation4 + $0x1], 1 }

</bundles_post_ra>
